<compile_context>
chip_gen: v6e
topology: v6e:2x2x1
jax: 0.10.0
libtpu: 0.0.40
codegen_flags: <defaults>
</compile_context>

<pallas_src>
import math
import functools

import jax
import jax.numpy as jnp
from jax.experimental import pallas as pl
from jax.experimental.pallas import tpu as pltpu


# ------------------------------ kernel helpers -------------------------------

_TRANS_B = (((1,), (1,)), ((), ()))   # contract last dims: q @ k^T without .T


def _layernorm(x, w, b, eps=1e-5):
    mu = jnp.mean(x, axis=-1, keepdims=True)
    var = jnp.mean((x - mu) ** 2, axis=-1, keepdims=True)
    return (x - mu) * jax.lax.rsqrt(var + eps) * w + b


def _mha(q_in, k_in, v_in, wq_t, bq, wk_t, bk, wv_t, bv, wo_t, bo, nhead):
    """PyTorch nn.MultiheadAttention forward (eval, no masks).

    Weights are pre-transposed to (in, out).  The output projection is folded
    per head into an f32 accumulator (no lane-axis concatenate)."""
    q = jnp.dot(q_in, wq_t, preferred_element_type=jnp.float32) + bq
    k = jnp.dot(k_in, wk_t, preferred_element_type=jnp.float32) + bk
    v = jnp.dot(v_in, wv_t, preferred_element_type=jnp.float32) + bv

    Sq, D = q.shape
    hd = D // nhead
    scale = 1.0 / math.sqrt(hd)

    acc = jnp.zeros((Sq, D), jnp.float32) + bo          # out-proj bias added once
    for h in range(nhead):                               # static unroll over heads
        sl = slice(h * hd, (h + 1) * hd)
        qh = q[:, sl]
        kh = k[:, sl]
        vh = v[:, sl]
        s = jax.lax.dot_general(qh, kh, _TRANS_B,
                                preferred_element_type=jnp.float32) * scale
        s = s - jnp.max(s, axis=-1, keepdims=True)
        p = jnp.exp(s)
        p = p * pl.reciprocal(jnp.sum(p, axis=-1, keepdims=True), approx=True)
        oh = jnp.dot(p, vh, preferred_element_type=jnp.float32)          # (Sq, hd)
        # head's share of the output projection: oh @ Wo[:, sl].T == oh @ wo_t[sl, :]
        acc = acc + jnp.dot(oh, wo_t[sl, :], preferred_element_type=jnp.float32)
    return acc


# --------------------------------- kernel ------------------------------------

def decoder_layer_kernel(
    memory_ref, outkv_ref, pos_ref, embed_ref,
    # self_attn (queries = learned embed, keys/values = memory)
    sa_wq_ref, sa_bq_ref, sa_wk_ref, sa_bk_ref, sa_wv_ref, sa_bv_ref,
    sa_wo_ref, sa_bo_ref,
    # multihead_attn (cross attention onto `out`)
    ca_wq_ref, ca_bq_ref, ca_wk_ref, ca_bk_ref, ca_wv_ref, ca_bv_ref,
    ca_wo_ref, ca_bo_ref,
    # FFN
    w1_ref, b1_ref, w2_ref, b2_ref,
    # norms
    ln1w_ref, ln1b_ref, ln2w_ref, ln2b_ref, ln3w_ref, ln3b_ref,
    # output
    tgt_ref,
    *, nhead,
):
    mem = memory_ref[0].astype(jnp.float32)    # (S, D)
    outm = outkv_ref[0].astype(jnp.float32)    # (S, D)
    pos = pos_ref[0].astype(jnp.float32)       # (S, D)
    tgt = embed_ref[...].astype(jnp.float32)   # (Q, D), Q == S in UniAD

    # --- self_attn block: q = tgt + pos, k = memory + pos, v = memory ---------
    tgt2 = _mha(tgt + pos, mem + pos, mem,
                sa_wq_ref[...], sa_bq_ref[...], sa_wk_ref[...], sa_bk_ref[...],
                sa_wv_ref[...], sa_bv_ref[...], sa_wo_ref[...], sa_bo_ref[...],
                nhead)
    tgt = _layernorm(tgt + tgt2, ln1w_ref[...], ln1b_ref[...])

    # --- multihead_attn block: q = tgt + pos, k = out + pos, v = out ----------
    tgt2 = _mha(tgt + pos, outm + pos, outm,
                ca_wq_ref[...], ca_bq_ref[...], ca_wk_ref[...], ca_bk_ref[...],
                ca_wv_ref[...], ca_bv_ref[...], ca_wo_ref[...], ca_bo_ref[...],
                nhead)
    tgt = _layernorm(tgt + tgt2, ln2w_ref[...], ln2b_ref[...])

    # --- FFN: linear1 -> ReLU -> linear2 (dropout = identity) -----------------
    h1 = jnp.maximum(
        jnp.dot(tgt, w1_ref[...], preferred_element_type=jnp.float32) + b1_ref[...],
        0.0)
    ffn = jnp.dot(h1, w2_ref[...], preferred_element_type=jnp.float32) + b2_ref[...]
    tgt = _layernorm(tgt + ffn, ln3w_ref[...], ln3b_ref[...])

    tgt_ref[0] = tgt.astype(tgt_ref.dtype)


# ------------------------------- JAX wrapper ---------------------------------

def _full_spec(shape):
    nd = len(shape)
    return pl.BlockSpec(shape, lambda b, _nd=nd: (0,) * _nd)


def transformer_decoder_layer_forward(out_sbd, memory_sbd, pos_sbd, params, nhead):
    """forward(out, memory, pos) of UniAD's TransformerDecoderLayer (post-norm).

    out_sbd / memory_sbd / pos_sbd: (S, B, D) — PyTorch MultiheadAttention layout.
    Returns tgt of shape (Q, B, D)  (Q = num_queries = feature_size[0]*[1] = S).
    """
    # Layout glue only: kernel works on (B, S, D) tiles, one batch per grid step.
    memory = jnp.transpose(memory_sbd, (1, 0, 2))
    outkv = jnp.transpose(out_sbd, (1, 0, 2))
    pos = jnp.transpose(pos_sbd, (1, 0, 2))
    B, S, D = memory.shape
    Q = params["embed"].shape[0]

    tile = pl.BlockSpec((1, S, D), lambda b: (b, 0, 0))
    out_tile = pl.BlockSpec((1, Q, D), lambda b: (b, 0, 0))

    weight_args = [
        params["embed"],
        params["sa_wq_t"], params["sa_bq"], params["sa_wk_t"], params["sa_bk"],
        params["sa_wv_t"], params["sa_bv"], params["sa_wo_t"], params["sa_bo"],
        params["ca_wq_t"], params["ca_bq"], params["ca_wk_t"], params["ca_bk"],
        params["ca_wv_t"], params["ca_bv"], params["ca_wo_t"], params["ca_bo"],
        params["w1_t"], params["b1"], params["w2_t"], params["b2"],
        params["ln1_w"], params["ln1_b"], params["ln2_w"], params["ln2_b"],
        params["ln3_w"], params["ln3_b"],
    ]
    weight_specs = [_full_spec(w.shape) for w in weight_args]

    tgt = pl.pallas_call(
        functools.partial(decoder_layer_kernel, nhead=nhead),
        out_shape=jax.ShapeDtypeStruct((B, Q, D), memory.dtype),
        grid_spec=pltpu.PrefetchScalarGridSpec(
            num_scalar_prefetch=0,
            grid=(B,),
            in_specs=[tile, tile, tile] + weight_specs,
            out_specs=out_tile,
        ),
        compiler_params=pltpu.CompilerParams(
            dimension_semantics=("parallel",)),   # v7x: shard batch over 2 TCs
    )(memory, outkv, pos, *weight_args)

    return jnp.transpose(tgt, (1, 0, 2))          # back to (Q, B, D)


# --------------------------- parameter construction --------------------------

def make_decoder_layer_params(key, hidden_dim, feature_size, nhead,
                              dim_feedforward, dtype=jnp.float32):
    """Mirrors PyTorch default inits; weights pre-transposed to (in, out)."""
    Q = feature_size[0] * feature_size[1]
    D = hidden_dim
    F_ = dim_feedforward
    ks = jax.random.split(key, 9)
    s_d = 1.0 / math.sqrt(D)
    s_f = 1.0 / math.sqrt(F_)

    def mha_params(k_w, k_o):
        # in_proj_weight is (3D, D); split into q/k/v and pre-transpose.
        in_proj = jax.random.uniform(k_w, (3 * D, D), dtype, minval=-s_d, maxval=s_d)
        wq, wk, wv = jnp.split(in_proj, 3, axis=0)
        wo = jax.random.uniform(k_o, (D, D), dtype, minval=-s_d, maxval=s_d)
        return {
            "wq_t": wq.T, "bq": jnp.zeros((1, D), dtype),
            "wk_t": wk.T, "bk": jnp.zeros((1, D), dtype),
            "wv_t": wv.T, "bv": jnp.zeros((1, D), dtype),
            "wo_t": wo.T, "bo": jnp.zeros((1, D), dtype),
        }

    sa = mha_params(ks[0], ks[1])
    ca = mha_params(ks[2], ks[3])
    p = {
        "embed": jax.random.normal(ks[4], (Q, D), dtype),          # nn.Embedding
        "w1_t": jax.random.uniform(ks[5], (F_, D), dtype, minval=-s_d, maxval=s_d).T,
        "b1": jax.random.uniform(ks[6], (1, F_), dtype, minval=-s_d, maxval=s_d),
        "w2_t": jax.random.uniform(ks[7], (D, F_), dtype, minval=-s_f, maxval=s_f).T,
        "b2": jax.random.uniform(ks[8], (1, D), dtype, minval=-s_f, maxval=s_f),
        "ln1_w": jnp.ones((1, D), dtype), "ln1_b": jnp.zeros((1, D), dtype),
        "ln2_w": jnp.ones((1, D), dtype), "ln2_b": jnp.zeros((1, D), dtype),
        "ln3_w": jnp.ones((1, D), dtype), "ln3_b": jnp.zeros((1, D), dtype),
    }
    for name, d in (("sa", sa), ("ca", ca)):
        for kk, vv in d.items():
            p[f"{name}_{kk}"] = vv
    return p


# ----------------------------------- main ------------------------------------

if __name__ == "__main__":
    hidden_dim = 32
    nhead = 4
    dim_feedforward = 64
    feature_size = (4, 4)                      # num_queries = 16
    B = 2
    S = feature_size[0] * feature_size[1]      # memory / out / pos seq length

    root = jax.random.PRNGKey(0)
    k_out, k_mem, k_pos, k_par = jax.random.split(root, 4)

    out_in = jax.random.normal(k_out, (S, B, hidden_dim), jnp.float32)
    memory = jax.random.normal(k_mem, (S, B, hidden_dim), jnp.float32)
    pos = jax.random.normal(k_pos, (S, B, hidden_dim), jnp.float32)

    params = make_decoder_layer_params(k_par, hidden_dim, feature_size, nhead,
                                       dim_feedforward)

    tgt = transformer_decoder_layer_forward(out_in, memory, pos, params, nhead)
    tgt = jax.block_until_ready(tgt)
    assert tgt.shape == (S, B, hidden_dim)
    assert bool(jnp.all(jnp.isfinite(tgt)))
    print("KERNEL_OK")
</pallas_src>

<mosaic_0001>
module attributes {stable_mosaic.version = 11 : i64} {
  func.func @decoder_layer_kernel(%arg0: i32, %arg1: memref<1x16x32xf32, #tpu.memory_space<vmem>>, %arg2: memref<1x16x32xf32, #tpu.memory_space<vmem>>, %arg3: memref<1x16x32xf32, #tpu.memory_space<vmem>>, %arg4: memref<16x32xf32, #tpu.memory_space<vmem>>, %arg5: memref<32x32xf32, #tpu.memory_space<vmem>>, %arg6: memref<1x32xf32, #tpu.memory_space<vmem>>, %arg7: memref<32x32xf32, #tpu.memory_space<vmem>>, %arg8: memref<1x32xf32, #tpu.memory_space<vmem>>, %arg9: memref<32x32xf32, #tpu.memory_space<vmem>>, %arg10: memref<1x32xf32, #tpu.memory_space<vmem>>, %arg11: memref<32x32xf32, #tpu.memory_space<vmem>>, %arg12: memref<1x32xf32, #tpu.memory_space<vmem>>, %arg13: memref<32x32xf32, #tpu.memory_space<vmem>>, %arg14: memref<1x32xf32, #tpu.memory_space<vmem>>, %arg15: memref<32x32xf32, #tpu.memory_space<vmem>>, %arg16: memref<1x32xf32, #tpu.memory_space<vmem>>, %arg17: memref<32x32xf32, #tpu.memory_space<vmem>>, %arg18: memref<1x32xf32, #tpu.memory_space<vmem>>, %arg19: memref<32x32xf32, #tpu.memory_space<vmem>>, %arg20: memref<1x32xf32, #tpu.memory_space<vmem>>, %arg21: memref<32x64xf32, #tpu.memory_space<vmem>>, %arg22: memref<1x64xf32, #tpu.memory_space<vmem>>, %arg23: memref<64x32xf32, #tpu.memory_space<vmem>>, %arg24: memref<1x32xf32, #tpu.memory_space<vmem>>, %arg25: memref<1x32xf32, #tpu.memory_space<vmem>>, %arg26: memref<1x32xf32, #tpu.memory_space<vmem>>, %arg27: memref<1x32xf32, #tpu.memory_space<vmem>>, %arg28: memref<1x32xf32, #tpu.memory_space<vmem>>, %arg29: memref<1x32xf32, #tpu.memory_space<vmem>>, %arg30: memref<1x32xf32, #tpu.memory_space<vmem>>, %arg31: memref<1x16x32xf32, #tpu.memory_space<vmem>>) attributes {dimension_semantics = [#tpu.dimension_semantics<parallel>], iteration_bounds = array<i64: 2>, scalar_prefetch = 0 : i64, scratch_operands = 0 : i64, tpu.core_type = #tpu.core_type<tc>, window_params = [{transform_indices = @transform_0, window_bounds = array<i64: 1, 16, 32>}, {transform_indices = @transform_1, window_bounds = array<i64: 1, 16, 32>}, {transform_indices = @transform_2, window_bounds = array<i64: 1, 16, 32>}, {pipeline_mode = #tpu.pipeline_mode<synchronous>, transform_indices = @transform_3, window_bounds = array<i64: 16, 32>}, {pipeline_mode = #tpu.pipeline_mode<synchronous>, transform_indices = @transform_4, window_bounds = array<i64: 32, 32>}, {pipeline_mode = #tpu.pipeline_mode<synchronous>, transform_indices = @transform_5, window_bounds = array<i64: 1, 32>}, {pipeline_mode = #tpu.pipeline_mode<synchronous>, transform_indices = @transform_6, window_bounds = array<i64: 32, 32>}, {pipeline_mode = #tpu.pipeline_mode<synchronous>, transform_indices = @transform_7, window_bounds = array<i64: 1, 32>}, {pipeline_mode = #tpu.pipeline_mode<synchronous>, transform_indices = @transform_8, window_bounds = array<i64: 32, 32>}, {pipeline_mode = #tpu.pipeline_mode<synchronous>, transform_indices = @transform_9, window_bounds = array<i64: 1, 32>}, {pipeline_mode = #tpu.pipeline_mode<synchronous>, transform_indices = @transform_10, window_bounds = array<i64: 32, 32>}, {pipeline_mode = #tpu.pipeline_mode<synchronous>, transform_indices = @transform_11, window_bounds = array<i64: 1, 32>}, {pipeline_mode = #tpu.pipeline_mode<synchronous>, transform_indices = @transform_12, window_bounds = array<i64: 32, 32>}, {pipeline_mode = #tpu.pipeline_mode<synchronous>, transform_indices = @transform_13, window_bounds = array<i64: 1, 32>}, {pipeline_mode = #tpu.pipeline_mode<synchronous>, transform_indices = @transform_14, window_bounds = array<i64: 32, 32>}, {pipeline_mode = #tpu.pipeline_mode<synchronous>, transform_indices = @transform_15, window_bounds = array<i64: 1, 32>}, {pipeline_mode = #tpu.pipeline_mode<synchronous>, transform_indices = @transform_16, window_bounds = array<i64: 32, 32>}, {pipeline_mode = #tpu.pipeline_mode<synchronous>, transform_indices = @transform_17, window_bounds = array<i64: 1, 32>}, {pipeline_mode = #tpu.pipeline_mode<synchronous>, transform_indices = @transform_18, window_bounds = array<i64: 32, 32>}, {pipeline_mode = #tpu.pipeline_mode<synchronous>, transform_indices = @transform_19, window_bounds = array<i64: 1, 32>}, {pipeline_mode = #tpu.pipeline_mode<synchronous>, transform_indices = @transform_20, window_bounds = array<i64: 32, 64>}, {pipeline_mode = #tpu.pipeline_mode<synchronous>, transform_indices = @transform_21, window_bounds = array<i64: 1, 64>}, {pipeline_mode = #tpu.pipeline_mode<synchronous>, transform_indices = @transform_22, window_bounds = array<i64: 64, 32>}, {pipeline_mode = #tpu.pipeline_mode<synchronous>, transform_indices = @transform_23, window_bounds = array<i64: 1, 32>}, {pipeline_mode = #tpu.pipeline_mode<synchronous>, transform_indices = @transform_24, window_bounds = array<i64: 1, 32>}, {pipeline_mode = #tpu.pipeline_mode<synchronous>, transform_indices = @transform_25, window_bounds = array<i64: 1, 32>}, {pipeline_mode = #tpu.pipeline_mode<synchronous>, transform_indices = @transform_26, window_bounds = array<i64: 1, 32>}, {pipeline_mode = #tpu.pipeline_mode<synchronous>, transform_indices = @transform_27, window_bounds = array<i64: 1, 32>}, {pipeline_mode = #tpu.pipeline_mode<synchronous>, transform_indices = @transform_28, window_bounds = array<i64: 1, 32>}, {pipeline_mode = #tpu.pipeline_mode<synchronous>, transform_indices = @transform_29, window_bounds = array<i64: 1, 32>}, {transform_indices = @transform_30, window_bounds = array<i64: 1, 16, 32>}]} {
    %c0 = arith.constant 0 : index
    %c0_0 = arith.constant 0 : index
    %c0_1 = arith.constant 0 : index
    %0 = vector.load %arg1[%c0, %c0_0, %c0_1] : memref<1x16x32xf32, #tpu.memory_space<vmem>>, vector<1x16x32xf32>
    %1 = vector.shape_cast %0 : vector<1x16x32xf32> to vector<16x32xf32>
    %c0_2 = arith.constant 0 : index
    %c0_3 = arith.constant 0 : index
    %c0_4 = arith.constant 0 : index
    %2 = vector.load %arg2[%c0_2, %c0_3, %c0_4] : memref<1x16x32xf32, #tpu.memory_space<vmem>>, vector<1x16x32xf32>
    %3 = vector.shape_cast %2 : vector<1x16x32xf32> to vector<16x32xf32>
    %c0_5 = arith.constant 0 : index
    %c0_6 = arith.constant 0 : index
    %c0_7 = arith.constant 0 : index
    %4 = vector.load %arg3[%c0_5, %c0_6, %c0_7] : memref<1x16x32xf32, #tpu.memory_space<vmem>>, vector<1x16x32xf32>
    %5 = vector.shape_cast %4 : vector<1x16x32xf32> to vector<16x32xf32>
    %c0_8 = arith.constant 0 : index
    %c0_9 = arith.constant 0 : index
    %6 = vector.load %arg4[%c0_8, %c0_9] : memref<16x32xf32, #tpu.memory_space<vmem>>, vector<16x32xf32>
    %7 = arith.addf %6, %5 : vector<16x32xf32>
    %8 = arith.addf %1, %5 : vector<16x32xf32>
    %c0_10 = arith.constant 0 : index
    %c0_11 = arith.constant 0 : index
    %9 = vector.load %arg5[%c0_10, %c0_11] : memref<32x32xf32, #tpu.memory_space<vmem>>, vector<32x32xf32>
    %c0_12 = arith.constant 0 : index
    %c0_13 = arith.constant 0 : index
    %10 = vector.load %arg6[%c0_12, %c0_13] : memref<1x32xf32, #tpu.memory_space<vmem>>, vector<1x32xf32>
    %c0_14 = arith.constant 0 : index
    %c0_15 = arith.constant 0 : index
    %11 = vector.load %arg7[%c0_14, %c0_15] : memref<32x32xf32, #tpu.memory_space<vmem>>, vector<32x32xf32>
    %c0_16 = arith.constant 0 : index
    %c0_17 = arith.constant 0 : index
    %12 = vector.load %arg8[%c0_16, %c0_17] : memref<1x32xf32, #tpu.memory_space<vmem>>, vector<1x32xf32>
    %c0_18 = arith.constant 0 : index
    %c0_19 = arith.constant 0 : index
    %13 = vector.load %arg9[%c0_18, %c0_19] : memref<32x32xf32, #tpu.memory_space<vmem>>, vector<32x32xf32>
    %c0_20 = arith.constant 0 : index
    %c0_21 = arith.constant 0 : index
    %14 = vector.load %arg10[%c0_20, %c0_21] : memref<1x32xf32, #tpu.memory_space<vmem>>, vector<1x32xf32>
    %c0_22 = arith.constant 0 : index
    %c0_23 = arith.constant 0 : index
    %15 = vector.load %arg11[%c0_22, %c0_23] : memref<32x32xf32, #tpu.memory_space<vmem>>, vector<32x32xf32>
    %c0_24 = arith.constant 0 : index
    %c0_25 = arith.constant 0 : index
    %16 = vector.load %arg12[%c0_24, %c0_25] : memref<1x32xf32, #tpu.memory_space<vmem>>, vector<1x32xf32>
    %cst = arith.constant dense<0.000000e+00> : vector<16x32xf32>
    %17 = tpu.matmul %7, %9, %cst {dimension_numbers = #tpu.dot_dimension_numbers<[1], [0], [0], [1], [0, 0, 1, 1], [], []>} : vector<16x32xf32>, vector<32x32xf32>, vector<16x32xf32> -> vector<16x32xf32>
    %18 = vector.broadcast %10 : vector<1x32xf32> to vector<16x32xf32>
    %19 = arith.addf %17, %18 : vector<16x32xf32>
    %cst_26 = arith.constant dense<0.000000e+00> : vector<16x32xf32>
    %20 = tpu.matmul %8, %11, %cst_26 {dimension_numbers = #tpu.dot_dimension_numbers<[1], [0], [0], [1], [0, 0, 1, 1], [], []>} : vector<16x32xf32>, vector<32x32xf32>, vector<16x32xf32> -> vector<16x32xf32>
    %21 = vector.broadcast %12 : vector<1x32xf32> to vector<16x32xf32>
    %22 = arith.addf %20, %21 : vector<16x32xf32>
    %cst_27 = arith.constant dense<0.000000e+00> : vector<16x32xf32>
    %23 = tpu.matmul %1, %13, %cst_27 {dimension_numbers = #tpu.dot_dimension_numbers<[1], [0], [0], [1], [0, 0, 1, 1], [], []>} : vector<16x32xf32>, vector<32x32xf32>, vector<16x32xf32> -> vector<16x32xf32>
    %24 = vector.broadcast %14 : vector<1x32xf32> to vector<16x32xf32>
    %25 = arith.addf %23, %24 : vector<16x32xf32>
    %cst_28 = arith.constant 0.000000e+00 : f32
    %26 = vector.broadcast %cst_28 : f32 to vector<16x32xf32>
    %27 = vector.broadcast %16 : vector<1x32xf32> to vector<16x32xf32>
    %28 = arith.addf %26, %27 : vector<16x32xf32>
    %29 = vector.extract_strided_slice %19 {offsets = [0, 0], sizes = [16, 8], strides = [1, 1]} : vector<16x32xf32> to vector<16x8xf32>
    %30 = vector.extract_strided_slice %22 {offsets = [0, 0], sizes = [16, 8], strides = [1, 1]} : vector<16x32xf32> to vector<16x8xf32>
    %31 = vector.extract_strided_slice %25 {offsets = [0, 0], sizes = [16, 8], strides = [1, 1]} : vector<16x32xf32> to vector<16x8xf32>
    %cst_29 = arith.constant dense<0.000000e+00> : vector<16x16xf32>
    %32 = tpu.matmul %29, %30, %cst_29 {dimension_numbers = #tpu.dot_dimension_numbers<[1], [1], [0], [0], [0, 0, 1, 0], [], []>} : vector<16x8xf32>, vector<16x8xf32>, vector<16x16xf32> -> vector<16x16xf32>
    %cst_30 = arith.constant 0.353553385 : f32
    %33 = vector.broadcast %cst_30 : f32 to vector<16x16xf32>
    %34 = arith.mulf %32, %33 : vector<16x16xf32>
    %cst_31 = arith.constant dense<0xFF800000> : vector<16xf32>
    %35 = vector.multi_reduction <maximumf>, %34, %cst_31 [1] : vector<16x16xf32> to vector<16xf32>
    %36 = vector.shape_cast %35 : vector<16xf32> to vector<16x1xf32>
    %37 = vector.broadcast %36 : vector<16x1xf32> to vector<16x16xf32>
    %38 = arith.subf %34, %37 : vector<16x16xf32>
    %39 = math.exp %38 : vector<16x16xf32>
    %cst_32 = arith.constant dense<0.000000e+00> : vector<16xf32>
    %40 = vector.multi_reduction <add>, %39, %cst_32 [1] : vector<16x16xf32> to vector<16xf32>
    %41 = vector.shape_cast %40 : vector<16xf32> to vector<16x1xf32>
    %42 = tpu.reciprocal %41 {approx = true} : vector<16x1xf32> -> vector<16x1xf32>
    %43 = vector.broadcast %42 : vector<16x1xf32> to vector<16x16xf32>
    %44 = arith.mulf %39, %43 : vector<16x16xf32>
    %cst_33 = arith.constant dense<0.000000e+00> : vector<16x8xf32>
    %45 = tpu.matmul %44, %31, %cst_33 {dimension_numbers = #tpu.dot_dimension_numbers<[1], [0], [0], [1], [0, 0, 1, 1], [], []>} : vector<16x16xf32>, vector<16x8xf32>, vector<16x8xf32> -> vector<16x8xf32>
    %46 = vector.extract_strided_slice %15 {offsets = [0, 0], sizes = [8, 32], strides = [1, 1]} : vector<32x32xf32> to vector<8x32xf32>
    %cst_34 = arith.constant dense<0.000000e+00> : vector<16x32xf32>
    %47 = tpu.matmul %45, %46, %cst_34 {dimension_numbers = #tpu.dot_dimension_numbers<[1], [0], [0], [1], [0, 0, 1, 1], [], []>} : vector<16x8xf32>, vector<8x32xf32>, vector<16x32xf32> -> vector<16x32xf32>
    %48 = arith.addf %28, %47 : vector<16x32xf32>
    %49 = vector.extract_strided_slice %19 {offsets = [0, 8], sizes = [16, 8], strides = [1, 1]} : vector<16x32xf32> to vector<16x8xf32>
    %50 = vector.extract_strided_slice %22 {offsets = [0, 8], sizes = [16, 8], strides = [1, 1]} : vector<16x32xf32> to vector<16x8xf32>
    %51 = vector.extract_strided_slice %25 {offsets = [0, 8], sizes = [16, 8], strides = [1, 1]} : vector<16x32xf32> to vector<16x8xf32>
    %cst_35 = arith.constant dense<0.000000e+00> : vector<16x16xf32>
    %52 = tpu.matmul %49, %50, %cst_35 {dimension_numbers = #tpu.dot_dimension_numbers<[1], [1], [0], [0], [0, 0, 1, 0], [], []>} : vector<16x8xf32>, vector<16x8xf32>, vector<16x16xf32> -> vector<16x16xf32>
    %cst_36 = arith.constant 0.353553385 : f32
    %53 = vector.broadcast %cst_36 : f32 to vector<16x16xf32>
    %54 = arith.mulf %52, %53 : vector<16x16xf32>
    %cst_37 = arith.constant dense<0xFF800000> : vector<16xf32>
    %55 = vector.multi_reduction <maximumf>, %54, %cst_37 [1] : vector<16x16xf32> to vector<16xf32>
    %56 = vector.shape_cast %55 : vector<16xf32> to vector<16x1xf32>
    %57 = vector.broadcast %56 : vector<16x1xf32> to vector<16x16xf32>
    %58 = arith.subf %54, %57 : vector<16x16xf32>
    %59 = math.exp %58 : vector<16x16xf32>
    %cst_38 = arith.constant dense<0.000000e+00> : vector<16xf32>
    %60 = vector.multi_reduction <add>, %59, %cst_38 [1] : vector<16x16xf32> to vector<16xf32>
    %61 = vector.shape_cast %60 : vector<16xf32> to vector<16x1xf32>
    %62 = tpu.reciprocal %61 {approx = true} : vector<16x1xf32> -> vector<16x1xf32>
    %63 = vector.broadcast %62 : vector<16x1xf32> to vector<16x16xf32>
    %64 = arith.mulf %59, %63 : vector<16x16xf32>
    %cst_39 = arith.constant dense<0.000000e+00> : vector<16x8xf32>
    %65 = tpu.matmul %64, %51, %cst_39 {dimension_numbers = #tpu.dot_dimension_numbers<[1], [0], [0], [1], [0, 0, 1, 1], [], []>} : vector<16x16xf32>, vector<16x8xf32>, vector<16x8xf32> -> vector<16x8xf32>
    %66 = vector.extract_strided_slice %15 {offsets = [8, 0], sizes = [8, 32], strides = [1, 1]} : vector<32x32xf32> to vector<8x32xf32>
    %cst_40 = arith.constant dense<0.000000e+00> : vector<16x32xf32>
    %67 = tpu.matmul %65, %66, %cst_40 {dimension_numbers = #tpu.dot_dimension_numbers<[1], [0], [0], [1], [0, 0, 1, 1], [], []>} : vector<16x8xf32>, vector<8x32xf32>, vector<16x32xf32> -> vector<16x32xf32>
    %68 = arith.addf %48, %67 : vector<16x32xf32>
    %69 = vector.extract_strided_slice %19 {offsets = [0, 16], sizes = [16, 8], strides = [1, 1]} : vector<16x32xf32> to vector<16x8xf32>
    %70 = vector.extract_strided_slice %22 {offsets = [0, 16], sizes = [16, 8], strides = [1, 1]} : vector<16x32xf32> to vector<16x8xf32>
    %71 = vector.extract_strided_slice %25 {offsets = [0, 16], sizes = [16, 8], strides = [1, 1]} : vector<16x32xf32> to vector<16x8xf32>
    %cst_41 = arith.constant dense<0.000000e+00> : vector<16x16xf32>
    %72 = tpu.matmul %69, %70, %cst_41 {dimension_numbers = #tpu.dot_dimension_numbers<[1], [1], [0], [0], [0, 0, 1, 0], [], []>} : vector<16x8xf32>, vector<16x8xf32>, vector<16x16xf32> -> vector<16x16xf32>
    %cst_42 = arith.constant 0.353553385 : f32
    %73 = vector.broadcast %cst_42 : f32 to vector<16x16xf32>
    %74 = arith.mulf %72, %73 : vector<16x16xf32>
    %cst_43 = arith.constant dense<0xFF800000> : vector<16xf32>
    %75 = vector.multi_reduction <maximumf>, %74, %cst_43 [1] : vector<16x16xf32> to vector<16xf32>
    %76 = vector.shape_cast %75 : vector<16xf32> to vector<16x1xf32>
    %77 = vector.broadcast %76 : vector<16x1xf32> to vector<16x16xf32>
    %78 = arith.subf %74, %77 : vector<16x16xf32>
    %79 = math.exp %78 : vector<16x16xf32>
    %cst_44 = arith.constant dense<0.000000e+00> : vector<16xf32>
    %80 = vector.multi_reduction <add>, %79, %cst_44 [1] : vector<16x16xf32> to vector<16xf32>
    %81 = vector.shape_cast %80 : vector<16xf32> to vector<16x1xf32>
    %82 = tpu.reciprocal %81 {approx = true} : vector<16x1xf32> -> vector<16x1xf32>
    %83 = vector.broadcast %82 : vector<16x1xf32> to vector<16x16xf32>
    %84 = arith.mulf %79, %83 : vector<16x16xf32>
    %cst_45 = arith.constant dense<0.000000e+00> : vector<16x8xf32>
    %85 = tpu.matmul %84, %71, %cst_45 {dimension_numbers = #tpu.dot_dimension_numbers<[1], [0], [0], [1], [0, 0, 1, 1], [], []>} : vector<16x16xf32>, vector<16x8xf32>, vector<16x8xf32> -> vector<16x8xf32>
    %86 = vector.extract_strided_slice %15 {offsets = [16, 0], sizes = [8, 32], strides = [1, 1]} : vector<32x32xf32> to vector<8x32xf32>
    %cst_46 = arith.constant dense<0.000000e+00> : vector<16x32xf32>
    %87 = tpu.matmul %85, %86, %cst_46 {dimension_numbers = #tpu.dot_dimension_numbers<[1], [0], [0], [1], [0, 0, 1, 1], [], []>} : vector<16x8xf32>, vector<8x32xf32>, vector<16x32xf32> -> vector<16x32xf32>
    %88 = arith.addf %68, %87 : vector<16x32xf32>
    %89 = vector.extract_strided_slice %19 {offsets = [0, 24], sizes = [16, 8], strides = [1, 1]} : vector<16x32xf32> to vector<16x8xf32>
    %90 = vector.extract_strided_slice %22 {offsets = [0, 24], sizes = [16, 8], strides = [1, 1]} : vector<16x32xf32> to vector<16x8xf32>
    %91 = vector.extract_strided_slice %25 {offsets = [0, 24], sizes = [16, 8], strides = [1, 1]} : vector<16x32xf32> to vector<16x8xf32>
    %cst_47 = arith.constant dense<0.000000e+00> : vector<16x16xf32>
    %92 = tpu.matmul %89, %90, %cst_47 {dimension_numbers = #tpu.dot_dimension_numbers<[1], [1], [0], [0], [0, 0, 1, 0], [], []>} : vector<16x8xf32>, vector<16x8xf32>, vector<16x16xf32> -> vector<16x16xf32>
    %cst_48 = arith.constant 0.353553385 : f32
    %93 = vector.broadcast %cst_48 : f32 to vector<16x16xf32>
    %94 = arith.mulf %92, %93 : vector<16x16xf32>
    %cst_49 = arith.constant dense<0xFF800000> : vector<16xf32>
    %95 = vector.multi_reduction <maximumf>, %94, %cst_49 [1] : vector<16x16xf32> to vector<16xf32>
    %96 = vector.shape_cast %95 : vector<16xf32> to vector<16x1xf32>
    %97 = vector.broadcast %96 : vector<16x1xf32> to vector<16x16xf32>
    %98 = arith.subf %94, %97 : vector<16x16xf32>
    %99 = math.exp %98 : vector<16x16xf32>
    %cst_50 = arith.constant dense<0.000000e+00> : vector<16xf32>
    %100 = vector.multi_reduction <add>, %99, %cst_50 [1] : vector<16x16xf32> to vector<16xf32>
    %101 = vector.shape_cast %100 : vector<16xf32> to vector<16x1xf32>
    %102 = tpu.reciprocal %101 {approx = true} : vector<16x1xf32> -> vector<16x1xf32>
    %103 = vector.broadcast %102 : vector<16x1xf32> to vector<16x16xf32>
    %104 = arith.mulf %99, %103 : vector<16x16xf32>
    %cst_51 = arith.constant dense<0.000000e+00> : vector<16x8xf32>
    %105 = tpu.matmul %104, %91, %cst_51 {dimension_numbers = #tpu.dot_dimension_numbers<[1], [0], [0], [1], [0, 0, 1, 1], [], []>} : vector<16x16xf32>, vector<16x8xf32>, vector<16x8xf32> -> vector<16x8xf32>
    %106 = vector.extract_strided_slice %15 {offsets = [24, 0], sizes = [8, 32], strides = [1, 1]} : vector<32x32xf32> to vector<8x32xf32>
    %cst_52 = arith.constant dense<0.000000e+00> : vector<16x32xf32>
    %107 = tpu.matmul %105, %106, %cst_52 {dimension_numbers = #tpu.dot_dimension_numbers<[1], [0], [0], [1], [0, 0, 1, 1], [], []>} : vector<16x8xf32>, vector<8x32xf32>, vector<16x32xf32> -> vector<16x32xf32>
    %108 = arith.addf %88, %107 : vector<16x32xf32>
    %109 = arith.addf %6, %108 : vector<16x32xf32>
    %c0_53 = arith.constant 0 : index
    %c0_54 = arith.constant 0 : index
    %110 = vector.load %arg25[%c0_53, %c0_54] : memref<1x32xf32, #tpu.memory_space<vmem>>, vector<1x32xf32>
    %c0_55 = arith.constant 0 : index
    %c0_56 = arith.constant 0 : index
    %111 = vector.load %arg26[%c0_55, %c0_56] : memref<1x32xf32, #tpu.memory_space<vmem>>, vector<1x32xf32>
    %cst_57 = arith.constant dense<0.000000e+00> : vector<16xf32>
    %112 = vector.multi_reduction <add>, %109, %cst_57 [1] : vector<16x32xf32> to vector<16xf32>
    %113 = vector.shape_cast %112 : vector<16xf32> to vector<16x1xf32>
    %cst_58 = arith.constant 3.200000e+01 : f32
    %114 = vector.broadcast %cst_58 : f32 to vector<16x1xf32>
    %115 = arith.divf %113, %114 : vector<16x1xf32>
    %116 = vector.broadcast %115 : vector<16x1xf32> to vector<16x32xf32>
    %117 = arith.subf %109, %116 : vector<16x32xf32>
    %118 = arith.mulf %117, %117 : vector<16x32xf32>
    %cst_59 = arith.constant dense<0.000000e+00> : vector<16xf32>
    %119 = vector.multi_reduction <add>, %118, %cst_59 [1] : vector<16x32xf32> to vector<16xf32>
    %120 = vector.shape_cast %119 : vector<16xf32> to vector<16x1xf32>
    %cst_60 = arith.constant 3.200000e+01 : f32
    %121 = vector.broadcast %cst_60 : f32 to vector<16x1xf32>
    %122 = arith.divf %120, %121 : vector<16x1xf32>
    %123 = vector.broadcast %115 : vector<16x1xf32> to vector<16x32xf32>
    %124 = arith.subf %109, %123 : vector<16x32xf32>
    %cst_61 = arith.constant 9.99999974E-6 : f32
    %125 = vector.broadcast %cst_61 : f32 to vector<16x1xf32>
    %126 = arith.addf %122, %125 : vector<16x1xf32>
    %127 = math.rsqrt %126 : vector<16x1xf32>
    %128 = vector.broadcast %127 : vector<16x1xf32> to vector<16x32xf32>
    %129 = arith.mulf %124, %128 : vector<16x32xf32>
    %130 = vector.broadcast %110 : vector<1x32xf32> to vector<16x32xf32>
    %131 = arith.mulf %129, %130 : vector<16x32xf32>
    %132 = vector.broadcast %111 : vector<1x32xf32> to vector<16x32xf32>
    %133 = arith.addf %131, %132 : vector<16x32xf32>
    %134 = arith.addf %133, %5 : vector<16x32xf32>
    %135 = arith.addf %3, %5 : vector<16x32xf32>
    %c0_62 = arith.constant 0 : index
    %c0_63 = arith.constant 0 : index
    %136 = vector.load %arg13[%c0_62, %c0_63] : memref<32x32xf32, #tpu.memory_space<vmem>>, vector<32x32xf32>
    %c0_64 = arith.constant 0 : index
    %c0_65 = arith.constant 0 : index
    %137 = vector.load %arg14[%c0_64, %c0_65] : memref<1x32xf32, #tpu.memory_space<vmem>>, vector<1x32xf32>
    %c0_66 = arith.constant 0 : index
    %c0_67 = arith.constant 0 : index
    %138 = vector.load %arg15[%c0_66, %c0_67] : memref<32x32xf32, #tpu.memory_space<vmem>>, vector<32x32xf32>
    %c0_68 = arith.constant 0 : index
    %c0_69 = arith.constant 0 : index
    %139 = vector.load %arg16[%c0_68, %c0_69] : memref<1x32xf32, #tpu.memory_space<vmem>>, vector<1x32xf32>
    %c0_70 = arith.constant 0 : index
    %c0_71 = arith.constant 0 : index
    %140 = vector.load %arg17[%c0_70, %c0_71] : memref<32x32xf32, #tpu.memory_space<vmem>>, vector<32x32xf32>
    %c0_72 = arith.constant 0 : index
    %c0_73 = arith.constant 0 : index
    %141 = vector.load %arg18[%c0_72, %c0_73] : memref<1x32xf32, #tpu.memory_space<vmem>>, vector<1x32xf32>
    %c0_74 = arith.constant 0 : index
    %c0_75 = arith.constant 0 : index
    %142 = vector.load %arg19[%c0_74, %c0_75] : memref<32x32xf32, #tpu.memory_space<vmem>>, vector<32x32xf32>
    %c0_76 = arith.constant 0 : index
    %c0_77 = arith.constant 0 : index
    %143 = vector.load %arg20[%c0_76, %c0_77] : memref<1x32xf32, #tpu.memory_space<vmem>>, vector<1x32xf32>
    %cst_78 = arith.constant dense<0.000000e+00> : vector<16x32xf32>
    %144 = tpu.matmul %134, %136, %cst_78 {dimension_numbers = #tpu.dot_dimension_numbers<[1], [0], [0], [1], [0, 0, 1, 1], [], []>} : vector<16x32xf32>, vector<32x32xf32>, vector<16x32xf32> -> vector<16x32xf32>
    %145 = vector.broadcast %137 : vector<1x32xf32> to vector<16x32xf32>
    %146 = arith.addf %144, %145 : vector<16x32xf32>
    %cst_79 = arith.constant dense<0.000000e+00> : vector<16x32xf32>
    %147 = tpu.matmul %135, %138, %cst_79 {dimension_numbers = #tpu.dot_dimension_numbers<[1], [0], [0], [1], [0, 0, 1, 1], [], []>} : vector<16x32xf32>, vector<32x32xf32>, vector<16x32xf32> -> vector<16x32xf32>
    %148 = vector.broadcast %139 : vector<1x32xf32> to vector<16x32xf32>
    %149 = arith.addf %147, %148 : vector<16x32xf32>
    %cst_80 = arith.constant dense<0.000000e+00> : vector<16x32xf32>
    %150 = tpu.matmul %3, %140, %cst_80 {dimension_numbers = #tpu.dot_dimension_numbers<[1], [0], [0], [1], [0, 0, 1, 1], [], []>} : vector<16x32xf32>, vector<32x32xf32>, vector<16x32xf32> -> vector<16x32xf32>
    %151 = vector.broadcast %141 : vector<1x32xf32> to vector<16x32xf32>
    %152 = arith.addf %150, %151 : vector<16x32xf32>
    %cst_81 = arith.constant 0.000000e+00 : f32
    %153 = vector.broadcast %cst_81 : f32 to vector<16x32xf32>
    %154 = vector.broadcast %143 : vector<1x32xf32> to vector<16x32xf32>
    %155 = arith.addf %153, %154 : vector<16x32xf32>
    %156 = vector.extract_strided_slice %146 {offsets = [0, 0], sizes = [16, 8], strides = [1, 1]} : vector<16x32xf32> to vector<16x8xf32>
    %157 = vector.extract_strided_slice %149 {offsets = [0, 0], sizes = [16, 8], strides = [1, 1]} : vector<16x32xf32> to vector<16x8xf32>
    %158 = vector.extract_strided_slice %152 {offsets = [0, 0], sizes = [16, 8], strides = [1, 1]} : vector<16x32xf32> to vector<16x8xf32>
    %cst_82 = arith.constant dense<0.000000e+00> : vector<16x16xf32>
    %159 = tpu.matmul %156, %157, %cst_82 {dimension_numbers = #tpu.dot_dimension_numbers<[1], [1], [0], [0], [0, 0, 1, 0], [], []>} : vector<16x8xf32>, vector<16x8xf32>, vector<16x16xf32> -> vector<16x16xf32>
    %cst_83 = arith.constant 0.353553385 : f32
    %160 = vector.broadcast %cst_83 : f32 to vector<16x16xf32>
    %161 = arith.mulf %159, %160 : vector<16x16xf32>
    %cst_84 = arith.constant dense<0xFF800000> : vector<16xf32>
    %162 = vector.multi_reduction <maximumf>, %161, %cst_84 [1] : vector<16x16xf32> to vector<16xf32>
    %163 = vector.shape_cast %162 : vector<16xf32> to vector<16x1xf32>
    %164 = vector.broadcast %163 : vector<16x1xf32> to vector<16x16xf32>
    %165 = arith.subf %161, %164 : vector<16x16xf32>
    %166 = math.exp %165 : vector<16x16xf32>
    %cst_85 = arith.constant dense<0.000000e+00> : vector<16xf32>
    %167 = vector.multi_reduction <add>, %166, %cst_85 [1] : vector<16x16xf32> to vector<16xf32>
    %168 = vector.shape_cast %167 : vector<16xf32> to vector<16x1xf32>
    %169 = tpu.reciprocal %168 {approx = true} : vector<16x1xf32> -> vector<16x1xf32>
    %170 = vector.broadcast %169 : vector<16x1xf32> to vector<16x16xf32>
    %171 = arith.mulf %166, %170 : vector<16x16xf32>
    %cst_86 = arith.constant dense<0.000000e+00> : vector<16x8xf32>
    %172 = tpu.matmul %171, %158, %cst_86 {dimension_numbers = #tpu.dot_dimension_numbers<[1], [0], [0], [1], [0, 0, 1, 1], [], []>} : vector<16x16xf32>, vector<16x8xf32>, vector<16x8xf32> -> vector<16x8xf32>
    %173 = vector.extract_strided_slice %142 {offsets = [0, 0], sizes = [8, 32], strides = [1, 1]} : vector<32x32xf32> to vector<8x32xf32>
    %cst_87 = arith.constant dense<0.000000e+00> : vector<16x32xf32>
    %174 = tpu.matmul %172, %173, %cst_87 {dimension_numbers = #tpu.dot_dimension_numbers<[1], [0], [0], [1], [0, 0, 1, 1], [], []>} : vector<16x8xf32>, vector<8x32xf32>, vector<16x32xf32> -> vector<16x32xf32>
    %175 = arith.addf %155, %174 : vector<16x32xf32>
    %176 = vector.extract_strided_slice %146 {offsets = [0, 8], sizes = [16, 8], strides = [1, 1]} : vector<16x32xf32> to vector<16x8xf32>
    %177 = vector.extract_strided_slice %149 {offsets = [0, 8], sizes = [16, 8], strides = [1, 1]} : vector<16x32xf32> to vector<16x8xf32>
    %178 = vector.extract_strided_slice %152 {offsets = [0, 8], sizes = [16, 8], strides = [1, 1]} : vector<16x32xf32> to vector<16x8xf32>
    %cst_88 = arith.constant dense<0.000000e+00> : vector<16x16xf32>
    %179 = tpu.matmul %176, %177, %cst_88 {dimension_numbers = #tpu.dot_dimension_numbers<[1], [1], [0], [0], [0, 0, 1, 0], [], []>} : vector<16x8xf32>, vector<16x8xf32>, vector<16x16xf32> -> vector<16x16xf32>
    %cst_89 = arith.constant 0.353553385 : f32
    %180 = vector.broadcast %cst_89 : f32 to vector<16x16xf32>
    %181 = arith.mulf %179, %180 : vector<16x16xf32>
    %cst_90 = arith.constant dense<0xFF800000> : vector<16xf32>
    %182 = vector.multi_reduction <maximumf>, %181, %cst_90 [1] : vector<16x16xf32> to vector<16xf32>
    %183 = vector.shape_cast %182 : vector<16xf32> to vector<16x1xf32>
    %184 = vector.broadcast %183 : vector<16x1xf32> to vector<16x16xf32>
    %185 = arith.subf %181, %184 : vector<16x16xf32>
    %186 = math.exp %185 : vector<16x16xf32>
    %cst_91 = arith.constant dense<0.000000e+00> : vector<16xf32>
    %187 = vector.multi_reduction <add>, %186, %cst_91 [1] : vector<16x16xf32> to vector<16xf32>
    %188 = vector.shape_cast %187 : vector<16xf32> to vector<16x1xf32>
    %189 = tpu.reciprocal %188 {approx = true} : vector<16x1xf32> -> vector<16x1xf32>
    %190 = vector.broadcast %189 : vector<16x1xf32> to vector<16x16xf32>
    %191 = arith.mulf %186, %190 : vector<16x16xf32>
    %cst_92 = arith.constant dense<0.000000e+00> : vector<16x8xf32>
    %192 = tpu.matmul %191, %178, %cst_92 {dimension_numbers = #tpu.dot_dimension_numbers<[1], [0], [0], [1], [0, 0, 1, 1], [], []>} : vector<16x16xf32>, vector<16x8xf32>, vector<16x8xf32> -> vector<16x8xf32>
    %193 = vector.extract_strided_slice %142 {offsets = [8, 0], sizes = [8, 32], strides = [1, 1]} : vector<32x32xf32> to vector<8x32xf32>
    %cst_93 = arith.constant dense<0.000000e+00> : vector<16x32xf32>
    %194 = tpu.matmul %192, %193, %cst_93 {dimension_numbers = #tpu.dot_dimension_numbers<[1], [0], [0], [1], [0, 0, 1, 1], [], []>} : vector<16x8xf32>, vector<8x32xf32>, vector<16x32xf32> -> vector<16x32xf32>
    %195 = arith.addf %175, %194 : vector<16x32xf32>
    %196 = vector.extract_strided_slice %146 {offsets = [0, 16], sizes = [16, 8], strides = [1, 1]} : vector<16x32xf32> to vector<16x8xf32>
    %197 = vector.extract_strided_slice %149 {offsets = [0, 16], sizes = [16, 8], strides = [1, 1]} : vector<16x32xf32> to vector<16x8xf32>
    %198 = vector.extract_strided_slice %152 {offsets = [0, 16], sizes = [16, 8], strides = [1, 1]} : vector<16x32xf32> to vector<16x8xf32>
    %cst_94 = arith.constant dense<0.000000e+00> : vector<16x16xf32>
    %199 = tpu.matmul %196, %197, %cst_94 {dimension_numbers = #tpu.dot_dimension_numbers<[1], [1], [0], [0], [0, 0, 1, 0], [], []>} : vector<16x8xf32>, vector<16x8xf32>, vector<16x16xf32> -> vector<16x16xf32>
    %cst_95 = arith.constant 0.353553385 : f32
    %200 = vector.broadcast %cst_95 : f32 to vector<16x16xf32>
    %201 = arith.mulf %199, %200 : vector<16x16xf32>
    %cst_96 = arith.constant dense<0xFF800000> : vector<16xf32>
    %202 = vector.multi_reduction <maximumf>, %201, %cst_96 [1] : vector<16x16xf32> to vector<16xf32>
    %203 = vector.shape_cast %202 : vector<16xf32> to vector<16x1xf32>
    %204 = vector.broadcast %203 : vector<16x1xf32> to vector<16x16xf32>
    %205 = arith.subf %201, %204 : vector<16x16xf32>
    %206 = math.exp %205 : vector<16x16xf32>
    %cst_97 = arith.constant dense<0.000000e+00> : vector<16xf32>
    %207 = vector.multi_reduction <add>, %206, %cst_97 [1] : vector<16x16xf32> to vector<16xf32>
    %208 = vector.shape_cast %207 : vector<16xf32> to vector<16x1xf32>
    %209 = tpu.reciprocal %208 {approx = true} : vector<16x1xf32> -> vector<16x1xf32>
    %210 = vector.broadcast %209 : vector<16x1xf32> to vector<16x16xf32>
    %211 = arith.mulf %206, %210 : vector<16x16xf32>
    %cst_98 = arith.constant dense<0.000000e+00> : vector<16x8xf32>
    %212 = tpu.matmul %211, %198, %cst_98 {dimension_numbers = #tpu.dot_dimension_numbers<[1], [0], [0], [1], [0, 0, 1, 1], [], []>} : vector<16x16xf32>, vector<16x8xf32>, vector<16x8xf32> -> vector<16x8xf32>
    %213 = vector.extract_strided_slice %142 {offsets = [16, 0], sizes = [8, 32], strides = [1, 1]} : vector<32x32xf32> to vector<8x32xf32>
    %cst_99 = arith.constant dense<0.000000e+00> : vector<16x32xf32>
    %214 = tpu.matmul %212, %213, %cst_99 {dimension_numbers = #tpu.dot_dimension_numbers<[1], [0], [0], [1], [0, 0, 1, 1], [], []>} : vector<16x8xf32>, vector<8x32xf32>, vector<16x32xf32> -> vector<16x32xf32>
    %215 = arith.addf %195, %214 : vector<16x32xf32>
    %216 = vector.extract_strided_slice %146 {offsets = [0, 24], sizes = [16, 8], strides = [1, 1]} : vector<16x32xf32> to vector<16x8xf32>
    %217 = vector.extract_strided_slice %149 {offsets = [0, 24], sizes = [16, 8], strides = [1, 1]} : vector<16x32xf32> to vector<16x8xf32>
    %218 = vector.extract_strided_slice %152 {offsets = [0, 24], sizes = [16, 8], strides = [1, 1]} : vector<16x32xf32> to vector<16x8xf32>
    %cst_100 = arith.constant dense<0.000000e+00> : vector<16x16xf32>
    %219 = tpu.matmul %216, %217, %cst_100 {dimension_numbers = #tpu.dot_dimension_numbers<[1], [1], [0], [0], [0, 0, 1, 0], [], []>} : vector<16x8xf32>, vector<16x8xf32>, vector<16x16xf32> -> vector<16x16xf32>
    %cst_101 = arith.constant 0.353553385 : f32
    %220 = vector.broadcast %cst_101 : f32 to vector<16x16xf32>
    %221 = arith.mulf %219, %220 : vector<16x16xf32>
    %cst_102 = arith.constant dense<0xFF800000> : vector<16xf32>
    %222 = vector.multi_reduction <maximumf>, %221, %cst_102 [1] : vector<16x16xf32> to vector<16xf32>
    %223 = vector.shape_cast %222 : vector<16xf32> to vector<16x1xf32>
    %224 = vector.broadcast %223 : vector<16x1xf32> to vector<16x16xf32>
    %225 = arith.subf %221, %224 : vector<16x16xf32>
    %226 = math.exp %225 : vector<16x16xf32>
    %cst_103 = arith.constant dense<0.000000e+00> : vector<16xf32>
    %227 = vector.multi_reduction <add>, %226, %cst_103 [1] : vector<16x16xf32> to vector<16xf32>
    %228 = vector.shape_cast %227 : vector<16xf32> to vector<16x1xf32>
    %229 = tpu.reciprocal %228 {approx = true} : vector<16x1xf32> -> vector<16x1xf32>
    %230 = vector.broadcast %229 : vector<16x1xf32> to vector<16x16xf32>
    %231 = arith.mulf %226, %230 : vector<16x16xf32>
    %cst_104 = arith.constant dense<0.000000e+00> : vector<16x8xf32>
    %232 = tpu.matmul %231, %218, %cst_104 {dimension_numbers = #tpu.dot_dimension_numbers<[1], [0], [0], [1], [0, 0, 1, 1], [], []>} : vector<16x16xf32>, vector<16x8xf32>, vector<16x8xf32> -> vector<16x8xf32>
    %233 = vector.extract_strided_slice %142 {offsets = [24, 0], sizes = [8, 32], strides = [1, 1]} : vector<32x32xf32> to vector<8x32xf32>
    %cst_105 = arith.constant dense<0.000000e+00> : vector<16x32xf32>
    %234 = tpu.matmul %232, %233, %cst_105 {dimension_numbers = #tpu.dot_dimension_numbers<[1], [0], [0], [1], [0, 0, 1, 1], [], []>} : vector<16x8xf32>, vector<8x32xf32>, vector<16x32xf32> -> vector<16x32xf32>
    %235 = arith.addf %215, %234 : vector<16x32xf32>
    %236 = arith.addf %133, %235 : vector<16x32xf32>
    %c0_106 = arith.constant 0 : index
    %c0_107 = arith.constant 0 : index
    %237 = vector.load %arg27[%c0_106, %c0_107] : memref<1x32xf32, #tpu.memory_space<vmem>>, vector<1x32xf32>
    %c0_108 = arith.constant 0 : index
    %c0_109 = arith.constant 0 : index
    %238 = vector.load %arg28[%c0_108, %c0_109] : memref<1x32xf32, #tpu.memory_space<vmem>>, vector<1x32xf32>
    %cst_110 = arith.constant dense<0.000000e+00> : vector<16xf32>
    %239 = vector.multi_reduction <add>, %236, %cst_110 [1] : vector<16x32xf32> to vector<16xf32>
    %240 = vector.shape_cast %239 : vector<16xf32> to vector<16x1xf32>
    %cst_111 = arith.constant 3.200000e+01 : f32
    %241 = vector.broadcast %cst_111 : f32 to vector<16x1xf32>
    %242 = arith.divf %240, %241 : vector<16x1xf32>
    %243 = vector.broadcast %242 : vector<16x1xf32> to vector<16x32xf32>
    %244 = arith.subf %236, %243 : vector<16x32xf32>
    %245 = arith.mulf %244, %244 : vector<16x32xf32>
    %cst_112 = arith.constant dense<0.000000e+00> : vector<16xf32>
    %246 = vector.multi_reduction <add>, %245, %cst_112 [1] : vector<16x32xf32> to vector<16xf32>
    %247 = vector.shape_cast %246 : vector<16xf32> to vector<16x1xf32>
    %cst_113 = arith.constant 3.200000e+01 : f32
    %248 = vector.broadcast %cst_113 : f32 to vector<16x1xf32>
    %249 = arith.divf %247, %248 : vector<16x1xf32>
    %250 = vector.broadcast %242 : vector<16x1xf32> to vector<16x32xf32>
    %251 = arith.subf %236, %250 : vector<16x32xf32>
    %cst_114 = arith.constant 9.99999974E-6 : f32
    %252 = vector.broadcast %cst_114 : f32 to vector<16x1xf32>
    %253 = arith.addf %249, %252 : vector<16x1xf32>
    %254 = math.rsqrt %253 : vector<16x1xf32>
    %255 = vector.broadcast %254 : vector<16x1xf32> to vector<16x32xf32>
    %256 = arith.mulf %251, %255 : vector<16x32xf32>
    %257 = vector.broadcast %237 : vector<1x32xf32> to vector<16x32xf32>
    %258 = arith.mulf %256, %257 : vector<16x32xf32>
    %259 = vector.broadcast %238 : vector<1x32xf32> to vector<16x32xf32>
    %260 = arith.addf %258, %259 : vector<16x32xf32>
    %c0_115 = arith.constant 0 : index
    %c0_116 = arith.constant 0 : index
    %261 = vector.load %arg21[%c0_115, %c0_116] : memref<32x64xf32, #tpu.memory_space<vmem>>, vector<32x64xf32>
    %cst_117 = arith.constant dense<0.000000e+00> : vector<16x64xf32>
    %262 = tpu.matmul %260, %261, %cst_117 {dimension_numbers = #tpu.dot_dimension_numbers<[1], [0], [0], [1], [0, 0, 1, 1], [], []>} : vector<16x32xf32>, vector<32x64xf32>, vector<16x64xf32> -> vector<16x64xf32>
    %c0_118 = arith.constant 0 : index
    %c0_119 = arith.constant 0 : index
    %263 = vector.load %arg22[%c0_118, %c0_119] : memref<1x64xf32, #tpu.memory_space<vmem>>, vector<1x64xf32>
    %264 = vector.broadcast %263 : vector<1x64xf32> to vector<16x64xf32>
    %265 = arith.addf %262, %264 : vector<16x64xf32>
    %cst_120 = arith.constant 0.000000e+00 : f32
    %266 = vector.broadcast %cst_120 : f32 to vector<16x64xf32>
    %267 = arith.maximumf %265, %266 : vector<16x64xf32>
    %c0_121 = arith.constant 0 : index
    %c0_122 = arith.constant 0 : index
    %268 = vector.load %arg23[%c0_121, %c0_122] : memref<64x32xf32, #tpu.memory_space<vmem>>, vector<64x32xf32>
    %cst_123 = arith.constant dense<0.000000e+00> : vector<16x32xf32>
    %269 = tpu.matmul %267, %268, %cst_123 {dimension_numbers = #tpu.dot_dimension_numbers<[1], [0], [0], [1], [0, 0, 1, 1], [], []>} : vector<16x64xf32>, vector<64x32xf32>, vector<16x32xf32> -> vector<16x32xf32>
    %c0_124 = arith.constant 0 : index
    %c0_125 = arith.constant 0 : index
    %270 = vector.load %arg24[%c0_124, %c0_125] : memref<1x32xf32, #tpu.memory_space<vmem>>, vector<1x32xf32>
    %271 = vector.broadcast %270 : vector<1x32xf32> to vector<16x32xf32>
    %272 = arith.addf %269, %271 : vector<16x32xf32>
    %273 = arith.addf %260, %272 : vector<16x32xf32>
    %c0_126 = arith.constant 0 : index
    %c0_127 = arith.constant 0 : index
    %274 = vector.load %arg29[%c0_126, %c0_127] : memref<1x32xf32, #tpu.memory_space<vmem>>, vector<1x32xf32>
    %c0_128 = arith.constant 0 : index
    %c0_129 = arith.constant 0 : index
    %275 = vector.load %arg30[%c0_128, %c0_129] : memref<1x32xf32, #tpu.memory_space<vmem>>, vector<1x32xf32>
    %cst_130 = arith.constant dense<0.000000e+00> : vector<16xf32>
    %276 = vector.multi_reduction <add>, %273, %cst_130 [1] : vector<16x32xf32> to vector<16xf32>
    %277 = vector.shape_cast %276 : vector<16xf32> to vector<16x1xf32>
    %cst_131 = arith.constant 3.200000e+01 : f32
    %278 = vector.broadcast %cst_131 : f32 to vector<16x1xf32>
    %279 = arith.divf %277, %278 : vector<16x1xf32>
    %280 = vector.broadcast %279 : vector<16x1xf32> to vector<16x32xf32>
    %281 = arith.subf %273, %280 : vector<16x32xf32>
    %282 = arith.mulf %281, %281 : vector<16x32xf32>
    %cst_132 = arith.constant dense<0.000000e+00> : vector<16xf32>
    %283 = vector.multi_reduction <add>, %282, %cst_132 [1] : vector<16x32xf32> to vector<16xf32>
    %284 = vector.shape_cast %283 : vector<16xf32> to vector<16x1xf32>
    %cst_133 = arith.constant 3.200000e+01 : f32
    %285 = vector.broadcast %cst_133 : f32 to vector<16x1xf32>
    %286 = arith.divf %284, %285 : vector<16x1xf32>
    %287 = vector.broadcast %279 : vector<16x1xf32> to vector<16x32xf32>
    %288 = arith.subf %273, %287 : vector<16x32xf32>
    %cst_134 = arith.constant 9.99999974E-6 : f32
    %289 = vector.broadcast %cst_134 : f32 to vector<16x1xf32>
    %290 = arith.addf %286, %289 : vector<16x1xf32>
    %291 = math.rsqrt %290 : vector<16x1xf32>
    %292 = vector.broadcast %291 : vector<16x1xf32> to vector<16x32xf32>
    %293 = arith.mulf %288, %292 : vector<16x32xf32>
    %294 = vector.broadcast %274 : vector<1x32xf32> to vector<16x32xf32>
    %295 = arith.mulf %293, %294 : vector<16x32xf32>
    %296 = vector.broadcast %275 : vector<1x32xf32> to vector<16x32xf32>
    %297 = arith.addf %295, %296 : vector<16x32xf32>
    %c0_135 = arith.constant 0 : index
    %c0_136 = arith.constant 0 : index
    %c0_137 = arith.constant 0 : index
    %298 = vector.load %arg31[%c0_135, %c0_136, %c0_137] : memref<1x16x32xf32, #tpu.memory_space<vmem>>, vector<1x16x32xf32>
    %299 = vector.shape_cast %298 : vector<1x16x32xf32> to vector<16x32xf32>
    %300 = vector.shape_cast %297 : vector<16x32xf32> to vector<1x16x32xf32>
    tpu.vector_store %arg31[%c0_135, %c0_136, %c0_137], %300 {strides = array<i32>} : memref<1x16x32xf32, #tpu.memory_space<vmem>>, vector<1x16x32xf32>,
    return
  }
  func.func @transform_0(%arg0: i32) -> (i32, i32, i32) {
    %c0_i32 = arith.constant 0 : i32
    %c0_i32_0 = arith.constant 0 : i32
    %c0_i32_1 = arith.constant 0 : i32
    return %arg0, %c0_i32, %c0_i32_0 : i32, i32, i32
  }
  func.func @transform_1(%arg0: i32) -> (i32, i32, i32) {
    %c0_i32 = arith.constant 0 : i32
    %c0_i32_0 = arith.constant 0 : i32
    %c0_i32_1 = arith.constant 0 : i32
    return %arg0, %c0_i32, %c0_i32_0 : i32, i32, i32
  }
  func.func @transform_2(%arg0: i32) -> (i32, i32, i32) {
    %c0_i32 = arith.constant 0 : i32
    %c0_i32_0 = arith.constant 0 : i32
    %c0_i32_1 = arith.constant 0 : i32
    return %arg0, %c0_i32, %c0_i32_0 : i32, i32, i32
  }
  func.func @transform_3(%arg0: i32) -> (i32, i32) {
    %c0_i32 = arith.constant 0 : i32
    %c0_i32_0 = arith.constant 0 : i32
    %c0_i32_1 = arith.constant 0 : i32
    return %c0_i32, %c0_i32_0 : i32, i32
  }
  func.func @transform_4(%arg0: i32) -> (i32, i32) {
    %c0_i32 = arith.constant 0 : i32
    %c0_i32_0 = arith.constant 0 : i32
    %c0_i32_1 = arith.constant 0 : i32
    return %c0_i32, %c0_i32_0 : i32, i32
  }
  func.func @transform_5(%arg0: i32) -> (i32, i32) {
    %c0_i32 = arith.constant 0 : i32
    %c0_i32_0 = arith.constant 0 : i32
    %c0_i32_1 = arith.constant 0 : i32
    return %c0_i32, %c0_i32_0 : i32, i32
  }
  func.func @transform_6(%arg0: i32) -> (i32, i32) {
    %c0_i32 = arith.constant 0 : i32
    %c0_i32_0 = arith.constant 0 : i32
    %c0_i32_1 = arith.constant 0 : i32
    return %c0_i32, %c0_i32_0 : i32, i32
  }
  func.func @transform_7(%arg0: i32) -> (i32, i32) {
    %c0_i32 = arith.constant 0 : i32
    %c0_i32_0 = arith.constant 0 : i32
    %c0_i32_1 = arith.constant 0 : i32
    return %c0_i32, %c0_i32_0 : i32, i32
  }
  func.func @transform_8(%arg0: i32) -> (i32, i32) {
    %c0_i32 = arith.constant 0 : i32
    %c0_i32_0 = arith.constant 0 : i32
    %c0_i32_1 = arith.constant 0 : i32
    return %c0_i32, %c0_i32_0 : i32, i32
  }
  func.func @transform_9(%arg0: i32) -> (i32, i32) {
    %c0_i32 = arith.constant 0 : i32
    %c0_i32_0 = arith.constant 0 : i32
    %c0_i32_1 = arith.constant 0 : i32
    return %c0_i32, %c0_i32_0 : i32, i32
  }
  func.func @transform_10(%arg0: i32) -> (i32, i32) {
    %c0_i32 = arith.constant 0 : i32
    %c0_i32_0 = arith.constant 0 : i32
    %c0_i32_1 = arith.constant 0 : i32
    return %c0_i32, %c0_i32_0 : i32, i32
  }
  func.func @transform_11(%arg0: i32) -> (i32, i32) {
    %c0_i32 = arith.constant 0 : i32
    %c0_i32_0 = arith.constant 0 : i32
    %c0_i32_1 = arith.constant 0 : i32
    return %c0_i32, %c0_i32_0 : i32, i32
  }
  func.func @transform_12(%arg0: i32) -> (i32, i32) {
    %c0_i32 = arith.constant 0 : i32
    %c0_i32_0 = arith.constant 0 : i32
    %c0_i32_1 = arith.constant 0 : i32
    return %c0_i32, %c0_i32_0 : i32, i32
  }
  func.func @transform_13(%arg0: i32) -> (i32, i32) {
    %c0_i32 = arith.constant 0 : i32
    %c0_i32_0 = arith.constant 0 : i32
    %c0_i32_1 = arith.constant 0 : i32
    return %c0_i32, %c0_i32_0 : i32, i32
  }
  func.func @transform_14(%arg0: i32) -> (i32, i32) {
    %c0_i32 = arith.constant 0 : i32
    %c0_i32_0 = arith.constant 0 : i32
    %c0_i32_1 = arith.constant 0 : i32
    return %c0_i32, %c0_i32_0 : i32, i32
  }
  func.func @transform_15(%arg0: i32) -> (i32, i32) {
    %c0_i32 = arith.constant 0 : i32
    %c0_i32_0 = arith.constant 0 : i32
    %c0_i32_1 = arith.constant 0 : i32
    return %c0_i32, %c0_i32_0 : i32, i32
  }
  func.func @transform_16(%arg0: i32) -> (i32, i32) {
    %c0_i32 = arith.constant 0 : i32
    %c0_i32_0 = arith.constant 0 : i32
    %c0_i32_1 = arith.constant 0 : i32
    return %c0_i32, %c0_i32_0 : i32, i32
  }
  func.func @transform_17(%arg0: i32) -> (i32, i32) {
    %c0_i32 = arith.constant 0 : i32
    %c0_i32_0 = arith.constant 0 : i32
    %c0_i32_1 = arith.constant 0 : i32
    return %c0_i32, %c0_i32_0 : i32, i32
  }
  func.func @transform_18(%arg0: i32) -> (i32, i32) {
    %c0_i32 = arith.constant 0 : i32
    %c0_i32_0 = arith.constant 0 : i32
    %c0_i32_1 = arith.constant 0 : i32
    return %c0_i32, %c0_i32_0 : i32, i32
  }
  func.func @transform_19(%arg0: i32) -> (i32, i32) {
    %c0_i32 = arith.constant 0 : i32
    %c0_i32_0 = arith.constant 0 : i32
    %c0_i32_1 = arith.constant 0 : i32
    return %c0_i32, %c0_i32_0 : i32, i32
  }
  func.func @transform_20(%arg0: i32) -> (i32, i32) {
    %c0_i32 = arith.constant 0 : i32
    %c0_i32_0 = arith.constant 0 : i32
    %c0_i32_1 = arith.constant 0 : i32
    return %c0_i32, %c0_i32_0 : i32, i32
  }
  func.func @transform_21(%arg0: i32) -> (i32, i32) {
    %c0_i32 = arith.constant 0 : i32
    %c0_i32_0 = arith.constant 0 : i32
    %c0_i32_1 = arith.constant 0 : i32
    return %c0_i32, %c0_i32_0 : i32, i32
  }
  func.func @transform_22(%arg0: i32) -> (i32, i32) {
    %c0_i32 = arith.constant 0 : i32
    %c0_i32_0 = arith.constant 0 : i32
    %c0_i32_1 = arith.constant 0 : i32
    return %c0_i32, %c0_i32_0 : i32, i32
  }
  func.func @transform_23(%arg0: i32) -> (i32, i32) {
    %c0_i32 = arith.constant 0 : i32
    %c0_i32_0 = arith.constant 0 : i32
    %c0_i32_1 = arith.constant 0 : i32
    return %c0_i32, %c0_i32_0 : i32, i32
  }
  func.func @transform_24(%arg0: i32) -> (i32, i32) {
    %c0_i32 = arith.constant 0 : i32
    %c0_i32_0 = arith.constant 0 : i32
    %c0_i32_1 = arith.constant 0 : i32
    return %c0_i32, %c0_i32_0 : i32, i32
  }
  func.func @transform_25(%arg0: i32) -> (i32, i32) {
    %c0_i32 = arith.constant 0 : i32
    %c0_i32_0 = arith.constant 0 : i32
    %c0_i32_1 = arith.constant 0 : i32
    return %c0_i32, %c0_i32_0 : i32, i32
  }
  func.func @transform_26(%arg0: i32) -> (i32, i32) {
    %c0_i32 = arith.constant 0 : i32
    %c0_i32_0 = arith.constant 0 : i32
    %c0_i32_1 = arith.constant 0 : i32
    return %c0_i32, %c0_i32_0 : i32, i32
  }
  func.func @transform_27(%arg0: i32) -> (i32, i32) {
    %c0_i32 = arith.constant 0 : i32
    %c0_i32_0 = arith.constant 0 : i32
    %c0_i32_1 = arith.constant 0 : i32
    return %c0_i32, %c0_i32_0 : i32, i32
  }
  func.func @transform_28(%arg0: i32) -> (i32, i32) {
    %c0_i32 = arith.constant 0 : i32
    %c0_i32_0 = arith.constant 0 : i32
    %c0_i32_1 = arith.constant 0 : i32
    return %c0_i32, %c0_i32_0 : i32, i32
  }
  func.func @transform_29(%arg0: i32) -> (i32, i32) {
    %c0_i32 = arith.constant 0 : i32
    %c0_i32_0 = arith.constant 0 : i32
    %c0_i32_1 = arith.constant 0 : i32
    return %c0_i32, %c0_i32_0 : i32, i32
  }
  func.func @transform_30(%arg0: i32) -> (i32, i32, i32) {
    %c0_i32 = arith.constant 0 : i32
    %c0_i32_0 = arith.constant 0 : i32
    %c0_i32_1 = arith.constant 0 : i32
    return %arg0, %c0_i32, %c0_i32_0 : i32, i32, i32
  }
}

</mosaic_0001>

<bundles_post_ra>
// kernel: tpu_custom_call.1
= control target key start
LH: loop header
LB: loop body
LE: loop exit
PB: predicated region body
PF: predicated region fallthrough
CT: control target
= control target key end

     0   :  { %s6027_s6 = smov 1   ;;  %s6028_s10 = smov 2   ;;  %s6824_s0 = inlined_call_operand.smem [shape: u32[31], index: -1, kind: input, shape index: {}] }
   0x1   :  { %s6089_s5 = sld [smem:[%s6824_s0]]   ;;  %s6029_s14 = smov 3  }
   0x2   :  { %s6094_s9 = sld [smem:[%s6824_s0 + %s6027_s6]]   ;;  %s6030_s18 = smov 4  }
   0x3   :  { %s6099_s13 = sld [smem:[%s6824_s0 + %s6028_s10]]   ;;  %s6031_s22 = smov 5  }
   0x4   :  { %s6104_s17 = sld [smem:[%s6824_s0 + %s6029_s14]]   ;;  %s6032_s26 = smov 6  }
   0x5   :  { %s6109_s21 = sld [smem:[%s6824_s0 + %s6030_s18]]   ;;  %s6033_s30 = smov 7  }
   0x6   :  { %s6114_s25 = sld [smem:[%s6824_s0 + %s6031_s22]]   ;;  %s6034_s4 = smov 8  }
   0x7   :  { %6838 = sst [smem:[#allocation39_spill]] %s6089_s5  ;;  %s6035_s10 = smov 9  }
   0x8   :  { %6839 = sst [smem:[#allocation40_spill]] %s6094_s9  ;;  %s6036_s15 = smov 10  }
   0x9   :  { %6840 = sst [smem:[#allocation41_spill]] %s6099_s13  ;;  %s6037_s20 = smov 11  }
   0xa   :  { %s6119_s29 = sld [smem:[%s6824_s0 + %s6032_s26]]   ;;  %s6038_s26 = smov 12  }
   0xb   :  { %6841 = sst [smem:[#allocation42_spill]] %s6109_s21  ;;  %s6039_s1 = smov 13  }
   0xc   :  { %s6124_s3 = sld [smem:[%s6824_s0 + %s6033_s30]]   ;;  %s6040_s7 = smov 14  }
   0xd   :  { %s6129_s8 = sld [smem:[%s6824_s0 + %s6034_s4]]   ;;  %s6042_s22 = smov 16  }
   0xe   :  { %s6134_s14 = sld [smem:[%s6824_s0 + %s6035_s10]]   ;;  %s6043_s28 = smov 17  }
   0xf   :  { %s6139_s19 = sld [smem:[%s6824_s0 + %s6036_s15]]   ;;  %s6041_s15 = smov 15  }
  0x10   :  { %6842 = sst [smem:[#allocation43_spill]] %s6119_s29 }
  0x11   :  { %s6144_s24 = sld [smem:[%s6824_s0 + %s6037_s20]]  }
  0x12   :  { %s6149_s30 = sld [smem:[%s6824_s0 + %s6038_s26]]  }
  0x13   :  { %s6154_s6 = sld [smem:[%s6824_s0 + %s6039_s1]]  }
  0x14   :  { %s6159_s12 = sld [smem:[%s6824_s0 + %s6040_s7]]   ;;  %s6044_s7 = smov 18  }
  0x15   :  { %s6164_s20 = sld [smem:[%s6824_s0 + %s6041_s15]]   ;;  %s6045_s15 = smov 19  }
  0x16   :  { %s6169_s27 = sld [smem:[%s6824_s0 + %s6042_s22]]   ;;  %s6046_s22 = smov 20  }
  0x17   :  { %s6174_s4 = sld [smem:[%s6824_s0 + %s6043_s28]]   ;;  %s6047_s28 = smov 21  }
  0x18   :  { %s6179_s9 = sld [smem:[%s6824_s0 + %s6044_s7]]   ;;  %s6048_s7 = smov 22  }
  0x19   :  { %s6184_s13 = sld [smem:[%s6824_s0 + %s6045_s15]]   ;;  %s6049_s15 = smov 23  }
  0x1a   :  { %s6189_s5 = sld [smem:[%s6824_s0 + %s6046_s22]]   ;;  %s6050_s22 = smov 24  }
  0x1d   :  { %6843 = sst [smem:[#allocation44_spill]] %s6174_s4 }
  0x1e   :  { %6844 = sst [smem:[#allocation45_spill]] %s6179_s9 }
  0x1f   :  { %6845 = sst [smem:[#allocation46_spill]] %s6184_s13 }
  0x20   :  { %6846 = sst [smem:[#allocation47_spill]] %s6189_s5 }
  0x21   :  { %s6194_s4 = sld [smem:[%s6824_s0 + %s6047_s28]]   ;;  %s6051_s28 = smov 25  }
  0x22   :  { %s6199_s9 = sld [smem:[%s6824_s0 + %s6048_s7]]   ;;  %s6052_s7 = smov 26  }
  0x23   :  { %s6204_s13 = sld [smem:[%s6824_s0 + %s6049_s15]]   ;;  %s6053_s15 = smov 27  }
  0x24   :  { %s6209_s5 = sld [smem:[%s6824_s0 + %s6050_s22]]   ;;  %s6054_s22 = smov 28  }
  0x27   :  { %6847 = sst [smem:[#allocation48_spill]] %s6194_s4 }
  0x28   :  { %6848 = sst [smem:[#allocation49_spill]] %s6199_s9 }
  0x29   :  { %6849 = sst [smem:[#allocation50_spill]] %s6204_s13 }
  0x2a   :  { %6850 = sst [smem:[#allocation51_spill]] %s6209_s5 }
  0x2b   :  { %s6214_s4 = sld [smem:[%s6824_s0 + %s6051_s28]]   ;;  %s6055_s28 = smov 29  }
  0x2c   :  { %s6219_s9 = sld [smem:[%s6824_s0 + %s6052_s7]]   ;;  %s6056_s7 = smov 30  }
  0x2d   :  { %s6224_s13 = sld [smem:[%s6824_s0 + %s6053_s15]]  }
  0x2e   :  { %s6229_s5 = sld [smem:[%s6824_s0 + %s6054_s22]]  }
  0x31   :  { %6851 = sst [smem:[#allocation52_spill]] %s6214_s4 }
  0x32   :  { %6852 = sst [smem:[#allocation53_spill]] %s6219_s9 }
  0x33   :  { %s6234_s4 = sld [smem:[%s6824_s0 + %s6055_s28]]  }
  0x34   :  { %s6239_s9 = sld [smem:[%s6824_s0 + %s6056_s7]]  }
  0x35   :  { %66 = vsyncpa [#allocation3], 0 }
  0x36   :  { %67 = vsyncpa [#allocation6], 0 }
  0x37   :  { %68 = vsyncpa [#allocation9], 0 }
  0x38   :  { %69 = vsyncpa [#allocation12], 0 }
  0x39   :  { %70 = vsyncpa [#allocation15], 0 }
  0x3a   :  { %71 = vsyncpa [#allocation18], 0 }
  0x3b   :  { %72 = vsyncpa [#allocation21], 0 }
  0x3c   :  { %73 = vsyncpa [#allocation24], 0 }
  0x3d   :  { %74 = vsyncpa [#allocation27], 0 }
  0x3e   :  { %75 = vsyncpa [#allocation4], 0 }
  0x3f   :  { %77 = vsyncpa [#allocation4 + $0x1], 0  ;;  %s6241_s15 = smov 0   ;;  %s6243_s16 = smov 0  }
  0x40   :  { %s6245_s18 = smov 0   ;;  %s6247_s22 = smov 0  }
  0x41 LB: > { %6853 = sst [smem:[#allocation54_spill]] %s6013_s15  ;;  %s6262_s0 = sadd.s32 4294967295, %s6025_s22   ;;  %s6025_s22 = sphi %s6247_s22, %s6905_s22   ;;  %s6021_s18 = sphi %s6245_s18, %s6907_s18   ;;  %s6017_s16 = sphi %s6243_s16, %s6909_s16   ;;  %s6013_s15 = sphi %s6241_s15, %s6908_s15  }
  0x42   : > { %6854 = sst [smem:[#allocation55_spill]] %s6021_s18  ;;  %s4664_s23 = sadd.s32 4294967294, %s6025_s22  }
  0x43   : > { %6855 = sst [smem:[#allocation56_spill]] %s6025_s22  ;;  %s6266_s26 = sadd.s32 1, %s6025_s22  }
  0x44   : > { %6856 = sst [smem:[#allocation57_spill]] %s6266_s26  ;;  %s735_s28 = sadd.s32 1, %s6021_s18 }
  0x45   : > { %s732_s1 = ssub.s32 %s6025_s22, %s6266_s26  ;;  %p745_p0 = scmp.ne.s32.totalorder %s6021_s18, %s6017_s16 }
  0x46   : > { %p733_p1 = scmp.eq.s32.totalorder %s732_s1, 0  ;;  %p746_p2 = scmp.eq.s32.totalorder %s6262_s0, 1 }
  0x47   : > { %p751_p3 = scmp.ne.s32.totalorder %s6017_s16, %s6013_s15  ;;  %p752_p4 = scmp.eq.s32.totalorder %s4664_s23, 1 }
  0x48   : > { %s6277_s2 = scalar_select %p733_p1, %s6021_s18, %s735_s28  }
  0x49   : > { %p6279_p5 = por %p746_p2, %p745_p0  ;;  %p6283_p6 = por %p752_p4, %p751_p3 }
  0x4a   : > { %6857 = sst [smem:[#allocation58_spill]] %s6277_s2  ;;  %p4665_p7 = scmp.ge.s32.totalorder %s6025_s22, 1 }
  0x4b   : > { %s6858_s7 = scalar_select %p6279_p5, 1, 0 }
  0x4c   : > { %s6859_s10 = scalar_select %p6283_p6, 1, 0 }
  0x4d   : > { %p759_p8 = scmp.lt.s32.totalorder %s6025_s22, 3  ;;  %p6833_p9 = scmp.eq.s32.totalorder %s6262_s0, 0 }
  0x4e   : > { %6860 = sst [smem:[#allocation59_spill]] %s6859_s10  ;;  %s6057_s23 = smov [#allocation5]  }
  0x4f   : > { %p6290_p10 = pnand %p4665_p7, %p759_p8  ;;  %s784_s28 = sshll.u32 %s6057_s23, 4  ;;  %s785_s28 = int_to_ptr.vmem [resolvable:$true] %s784_s28 }
  0x50   : > { %s6058_s2 = smov [#allocation8]   ;;  %s6059_s26 = smov [#allocation11]  }
  0x51   : > { %s6861_s11 = scalar_select %p6290_p10, 1, 0 }
  0x52   : > { %p5266_p11 = pneg %p6290_p10  ;;  %s808_s18 = sshll.u32 %s6058_s2, 4  ;;  %s809_s18 = int_to_ptr.vmem [resolvable:$true] %s808_s18 }
  0x53   : > { %s832_s10 = sshll.u32 %s6059_s26, 4  ;;  %s5524_s22 = scalar_lea.vmem %s785_s28, 512  ;;  %s833_s10 = int_to_ptr.vmem [resolvable:$true] %s832_s10 }
  0x54   : > { %p6298_p12 = pnand %p6833_p9, %p5266_p11  ;;  %p5525_p0 = scmp.ne.s32.totalorder %s785_s28, %s5524_s22 }
  0x55   : > { %p5532_p3 = scmp.lt.s32.totalorder %s785_s28, %s785_s28  ;;  %p5533_p4 = scmp.lt.s32.totalorder %s5524_s22, %s5524_s22 }
  0x56   : > { %p6304_p13 = pneg %p6298_p12 }
  0x57   : > { %p5534_p7 = por %p5533_p4, %p5532_p3 }
  0x58   : > { %p5527_p1 = pnand %p5525_p0, %p6304_p13 }
  0x5a   : > { %p5528_p2 = pneg %p5527_p1 }
  0x5c   : > { %p5535_p8 = pnand %p5534_p7, %p5528_p2 }
  0x5e   : > { %5538 = shalt.err (!%p5535_p8)
}
  0x5f   : > { %s6835_s2 = smov 128   ;;  %s6864_s21 = sld [smem:[#allocation42_spill]] }
  0x60   : > { %s6836_s26 = smov 8   ;;  %s5550_s23 = scalar_lea.vmem %s809_s18, 512 }
  0x61   : > { %p5551_p11 = scmp.ne.s32.totalorder %s809_s18, %s5550_s23  ;;  %p5558_p9 = scmp.lt.s32.totalorder %s809_s18, %s809_s18 }
  0x62   : > { %p5559_p6 = scmp.lt.s32.totalorder %s5550_s23, %s5550_s23 }
  0x63   : > { %p5553_p0 = pnand %p5551_p11, %p6304_p13 }
  0x64   : > { %p5560_p3 = por %p5559_p6, %p5558_p9 }
  0x65   : > { %5272 = dma.hbm_to_vmem [thread:$0]  (!%p6298_p12), %s6864_s21, 512, %s785_s28, [#allocation6], %s6835_s2, %s6835_s2, %s6836_s26  }
  0x66   : > { %p5554_p1 = pneg %p5553_p0 }
  0x68   : > { %p5561_p2 = pnand %p5560_p3, %p5554_p1 }
  0x6a   : > { %5564 = shalt.err (!%p5561_p2)
}
  0x6b   : > { %s6865_s29 = sld [smem:[#allocation43_spill]]  ;;  %s5576_s22 = scalar_lea.vmem %s833_s10, 512 }
  0x6c   : > { %p5577_p4 = scmp.ne.s32.totalorder %s833_s10, %s5576_s22  ;;  %p5584_p11 = scmp.lt.s32.totalorder %s833_s10, %s833_s10 }
  0x6d   : > { %p5585_p0 = scmp.lt.s32.totalorder %s5576_s22, %s5576_s22 }
  0x6e   : > { %p5579_p7 = pnand %p5577_p4, %p6304_p13 }
  0x6f   : > { %p5586_p5 = por %p5585_p0, %p5584_p11 }
  0x70   : > { %p5580_p8 = pneg %p5579_p7 }
  0x71   : > { %5278 = dma.hbm_to_vmem [thread:$0]  (!%p6298_p12), %s6865_s29, 512, %s809_s18, [#allocation9], %s6835_s2, %s6835_s2, %s6836_s26  }
  0x72   : > { %p5587_p6 = pnand %p5586_p5, %p5580_p8 }
  0x74   : > { %5590 = shalt.err (!%p5587_p6)
}
  0x75   : > { %5284 = dma.hbm_to_vmem [thread:$0]  (!%p6298_p12), %s6129_s8, 512, %s833_s10, [#allocation12], %s6835_s2, %s6835_s2, %s6836_s26  }
  0x76   : > { %s6062_s18 = smov [#allocation14]   ;;  %s6063_s23 = smov [#allocation17]  }
  0x77   : > { %s856_s28 = sshll.u32 %s6062_s18, 4  ;;  %s880_s21 = sshll.u32 %s6063_s23, 4  ;;  %s857_s28 = int_to_ptr.vmem [resolvable:$true] %s856_s28  ;;  %s881_s21 = int_to_ptr.vmem [resolvable:$true] %s880_s21 }
  0x78   : > { %s5602_s29 = scalar_lea.vmem %s857_s28, 512  ;;  %p5610_p5 = scmp.lt.s32.totalorder %s857_s28, %s857_s28 }
  0x79   : > { %p5603_p9 = scmp.ne.s32.totalorder %s857_s28, %s5602_s29  ;;  %p5611_p2 = scmp.lt.s32.totalorder %s5602_s29, %s5602_s29 }
  0x7b   : > { %p5605_p1 = pnand %p5603_p9, %p6304_p13  ;;  %p5612_p4 = por %p5611_p2, %p5610_p5 }
  0x7d   : > { %p5606_p3 = pneg %p5605_p1 }
  0x7f   : > { %p5613_p7 = pnand %p5612_p4, %p5606_p3 }
  0x81   : > { %5616 = shalt.err (!%p5613_p7)
}
  0x82   : > { %5290 = dma.hbm_to_vmem [thread:$0]  (!%p6298_p12), %s6139_s19, 512, %s857_s28, [#allocation15], %s6835_s2, %s6835_s2, %s6836_s26  }
  0x83   : > { %s5628_s10 = scalar_lea.vmem %s881_s21, 512  ;;  %p5636_p6 = scmp.lt.s32.totalorder %s881_s21, %s881_s21 }
  0x84   : > { %p5629_p8 = scmp.ne.s32.totalorder %s881_s21, %s5628_s10  ;;  %p5637_p9 = scmp.lt.s32.totalorder %s5628_s10, %s5628_s10 }
  0x86   : > { %p5631_p11 = pnand %p5629_p8, %p6304_p13  ;;  %p5638_p1 = por %p5637_p9, %p5636_p6 }
  0x88   : > { %p5632_p0 = pneg %p5631_p11 }
  0x8a   : > { %p5639_p5 = pnand %p5638_p1, %p5632_p0 }
  0x8c   : > { %5642 = shalt.err (!%p5639_p5)
}
  0x8d   : > { %5296 = dma.hbm_to_vmem [thread:$0]  (!%p6298_p12), %s6149_s30, 512, %s881_s21, [#allocation18], %s6835_s2, %s6835_s2, %s6836_s26  }
  0x8e   : > { %s6064_s29 = smov [#allocation20]   ;;  %s6065_s18 = smov [#allocation23]  }
  0x8f   : > { %s904_s22 = sshll.u32 %s6064_s29, 4  ;;  %s928_s28 = sshll.u32 %s6065_s18, 4  ;;  %s905_s22 = int_to_ptr.vmem [resolvable:$true] %s904_s22  ;;  %s929_s28 = int_to_ptr.vmem [resolvable:$true] %s928_s28 }
  0x90   : > { %s5654_s23 = scalar_lea.vmem %s905_s22, 512  ;;  %p5662_p7 = scmp.lt.s32.totalorder %s905_s22, %s905_s22 }
  0x91   : > { %p5655_p3 = scmp.ne.s32.totalorder %s905_s22, %s5654_s23  ;;  %p5663_p8 = scmp.lt.s32.totalorder %s5654_s23, %s5654_s23 }
  0x93   : > { %p5657_p2 = pnand %p5655_p3, %p6304_p13  ;;  %p5664_p11 = por %p5663_p8, %p5662_p7 }
  0x95   : > { %p5658_p4 = pneg %p5657_p2 }
  0x97   : > { %p5665_p0 = pnand %p5664_p11, %p5658_p4 }
  0x99   : > { %5668 = shalt.err (!%p5665_p0)
}
  0x9a   : > { %5302 = dma.hbm_to_vmem [thread:$0]  (!%p6298_p12), %s6159_s12, 512, %s905_s22, [#allocation21], %s6835_s2, %s6835_s2, %s6836_s26  }
  0x9b   : > { %s5680_s21 = scalar_lea.vmem %s929_s28, 512  ;;  %p5688_p5 = scmp.lt.s32.totalorder %s929_s28, %s929_s28 }
  0x9c   : > { %p5681_p6 = scmp.ne.s32.totalorder %s929_s28, %s5680_s21  ;;  %p5689_p3 = scmp.lt.s32.totalorder %s5680_s21, %s5680_s21 }
  0x9e   : > { %p5683_p9 = pnand %p5681_p6, %p6304_p13  ;;  %p5690_p2 = por %p5689_p3, %p5688_p5 }
  0xa0   : > { %p5684_p1 = pneg %p5683_p9 }
  0xa2   : > { %p5691_p7 = pnand %p5690_p2, %p5684_p1 }
  0xa4   : > { %5694 = shalt.err (!%p5691_p7)
}
  0xa5   : > { %5308 = dma.hbm_to_vmem [thread:$0]  (!%p6298_p12), %s6169_s27, 512, %s929_s28, [#allocation24], %s6835_s2, %s6835_s2, %s6836_s26  }
  0xa6   : > { %s6066_s10 = smov [#allocation2]   ;;  %s6067_s22 = smov [#allocation7]  }
  0xa7   : > { %s771_s29 = sshll.u32 %s6066_s10, 4  ;;  %s798_s18 = sshll.u32 %s6067_s22, 4  ;;  %s772_s29 = int_to_ptr.vmem [resolvable:$true] %s771_s29  ;;  %s799_s18 = int_to_ptr.vmem [resolvable:$true] %s798_s18 }
  0xa8   : > { %s5706_s23 = scalar_lea.vmem %s772_s29, 256  ;;  %p5714_p0 = scmp.lt.s32.totalorder %s772_s29, %s772_s29 }
  0xa9   : > { %p5707_p4 = scmp.ne.s32.totalorder %s772_s29, %s5706_s23  ;;  %p5715_p6 = scmp.lt.s32.totalorder %s5706_s23, %s5706_s23 }
  0xab   : > { %p5709_p8 = pnand %p5707_p4, %p6304_p13  ;;  %p5716_p9 = por %p5715_p6, %p5714_p0 }
  0xad   : > { %p5710_p11 = pneg %p5709_p8 }
  0xaf   : > { %p5717_p1 = pnand %p5716_p9, %p5710_p11 }
  0xb1   : > { %5720 = shalt.err (!%p5717_p1)
}
  0xb2   : > { %5269 = dma.hbm_to_vmem [thread:$0]  (!%p6298_p12), %s6104_s17, 256, %s772_s29, [#allocation3], %s6835_s2, %s6835_s2, %s6836_s26  }
  0xb3   : > { %s5732_s28 = scalar_lea.vmem %s799_s18, 16  ;;  %s5739_s21 = scalar_lea.vmem %s799_s18, 32 }
  0xb4   : > { %p5733_p5 = scmp.ne.s32.totalorder %s799_s18, %s5732_s28  ;;  %p5740_p7 = scmp.lt.s32.totalorder %s799_s18, %s799_s18 }
  0xb5   : > { %p5741_p4 = scmp.lt.s32.totalorder %s5739_s21, %s5732_s28 }
  0xb6   : > { %p5735_p3 = pnand %p5733_p5, %p6304_p13 }
  0xb7   : > { %p5742_p8 = por %p5741_p4, %p5740_p7 }
  0xb8   : > { %p5736_p2 = pneg %p5735_p3 }
  0xba   : > { %p5743_p11 = pnand %p5742_p8, %p5736_p2 }
  0xbc   : > { %5746 = shalt.err (!%p5743_p11)
}
  0xbd   : > { %5275 = dma.hbm_to_vmem [thread:$0]  (!%p6298_p12), %s6114_s25, 16, %s799_s18, [#allocation6]  }
  0xbe   : > { %s6068_s10 = smov [#allocation10]   ;;  %s6069_s29 = smov [#allocation13]  }
  0xbf   : > { %s822_s22 = sshll.u32 %s6068_s10, 4  ;;  %s846_s23 = sshll.u32 %s6069_s29, 4  ;;  %s823_s22 = int_to_ptr.vmem [resolvable:$true] %s822_s22  ;;  %s847_s23 = int_to_ptr.vmem [resolvable:$true] %s846_s23 }
  0xc0   : > { %s5758_s2 = scalar_lea.vmem %s823_s22, 16  ;;  %s5765_s26 = scalar_lea.vmem %s823_s22, 32 }
  0xc1   : > { %p5759_p0 = scmp.ne.s32.totalorder %s823_s22, %s5758_s2  ;;  %p5766_p1 = scmp.lt.s32.totalorder %s823_s22, %s823_s22 }
  0xc2   : > { %p5767_p5 = scmp.lt.s32.totalorder %s5765_s26, %s5758_s2 }
  0xc3   : > { %p5761_p6 = pnand %p5759_p0, %p6304_p13 }
  0xc4   : > { %p5768_p3 = por %p5767_p5, %p5766_p1 }
  0xc5   : > { %p5762_p9 = pneg %p5761_p6 }
  0xc7   : > { %p5769_p2 = pnand %p5768_p3, %p5762_p9 }
  0xc9   : > { %5772 = shalt.err (!%p5769_p2)
}
  0xca   : > { %5281 = dma.hbm_to_vmem [thread:$0]  (!%p6298_p12), %s6124_s3, 16, %s823_s22, [#allocation9]  }
  0xcb   : > { %s5784_s18 = scalar_lea.vmem %s847_s23, 16  ;;  %s5791_s28 = scalar_lea.vmem %s847_s23, 32 }
  0xcc   : > { %p5785_p7 = scmp.ne.s32.totalorder %s847_s23, %s5784_s18  ;;  %p5792_p11 = scmp.lt.s32.totalorder %s847_s23, %s847_s23 }
  0xcd   : > { %p5793_p0 = scmp.lt.s32.totalorder %s5791_s28, %s5784_s18 }
  0xce   : > { %p5787_p4 = pnand %p5785_p7, %p6304_p13 }
  0xcf   : > { %p5794_p6 = por %p5793_p0, %p5792_p11 }
  0xd0   : > { %p5788_p8 = pneg %p5787_p4 }
  0xd2   : > { %p5795_p10 = pnand %p5794_p6, %p5788_p8 }
  0xd4   : > { %5798 = shalt.err (!%p5795_p10)
}
  0xd5   : > { %5287 = dma.hbm_to_vmem [thread:$0]  (!%p6298_p12), %s6134_s14, 16, %s847_s23, [#allocation12]  }
  0xd6   : > { %s6070_s2 = smov [#allocation16]   ;;  %s6071_s21 = smov [#allocation19]  }
  0xd7   : > { %s870_s26 = sshll.u32 %s6070_s2, 4  ;;  %s894_s10 = sshll.u32 %s6071_s21, 4  ;;  %s871_s26 = int_to_ptr.vmem [resolvable:$true] %s870_s26  ;;  %s895_s10 = int_to_ptr.vmem [resolvable:$true] %s894_s10 }
  0xd8   : > { %s5810_s22 = scalar_lea.vmem %s871_s26, 16  ;;  %s5817_s29 = scalar_lea.vmem %s871_s26, 32 }
  0xd9   : > { %p5811_p9 = scmp.ne.s32.totalorder %s871_s26, %s5810_s22  ;;  %p5818_p3 = scmp.lt.s32.totalorder %s871_s26, %s871_s26 }
  0xda   : > { %p5819_p2 = scmp.lt.s32.totalorder %s5817_s29, %s5810_s22 }
  0xdb   : > { %p5813_p1 = pnand %p5811_p9, %p6304_p13 }
  0xdc   : > { %p5820_p7 = por %p5819_p2, %p5818_p3 }
  0xdd   : > { %p5814_p5 = pneg %p5813_p1 }
  0xdf   : > { %p5821_p10 = pnand %p5820_p7, %p5814_p5 }
  0xe1   : > { %5824 = shalt.err (!%p5821_p10)
}
  0xe2   : > { %5293 = dma.hbm_to_vmem [thread:$0]  (!%p6298_p12), %s6144_s24, 16, %s871_s26, [#allocation15]  }
  0xe3   : > { %s5836_s23 = scalar_lea.vmem %s895_s10, 16  ;;  %s5843_s18 = scalar_lea.vmem %s895_s10, 32 }
  0xe4   : > { %p5837_p4 = scmp.ne.s32.totalorder %s895_s10, %s5836_s23  ;;  %p5844_p0 = scmp.lt.s32.totalorder %s895_s10, %s895_s10 }
  0xe5   : > { %p5845_p6 = scmp.lt.s32.totalorder %s5843_s18, %s5836_s23 }
  0xe6   : > { %p5839_p8 = pnand %p5837_p4, %p6304_p13 }
  0xe7   : > { %p5846_p9 = por %p5845_p6, %p5844_p0 }
  0xe8   : > { %p5840_p11 = pneg %p5839_p8 }
  0xea   : > { %p5847_p1 = pnand %p5846_p9, %p5840_p11 }
  0xec   : > { %5850 = shalt.err (!%p5847_p1)
}
  0xed   : > { %5299 = dma.hbm_to_vmem [thread:$0]  (!%p6298_p12), %s6154_s6, 16, %s895_s10, [#allocation18]  }
  0xee   : > { %s6072_s28 = smov [#allocation22]   ;;  %s6073_s26 = smov [#allocation25]  }
  0xef   : > { %s918_s2 = sshll.u32 %s6072_s28, 4  ;;  %s942_s21 = sshll.u32 %s6073_s26, 4  ;;  %s919_s2 = int_to_ptr.vmem [resolvable:$true] %s918_s2  ;;  %s943_s21 = int_to_ptr.vmem [resolvable:$true] %s942_s21 }
  0xf0   : > { %s5862_s22 = scalar_lea.vmem %s919_s2, 16  ;;  %s5869_s29 = scalar_lea.vmem %s919_s2, 32 }
  0xf1   : > { %p5863_p5 = scmp.ne.s32.totalorder %s919_s2, %s5862_s22  ;;  %p5870_p7 = scmp.lt.s32.totalorder %s919_s2, %s919_s2 }
  0xf2   : > { %p5871_p10 = scmp.lt.s32.totalorder %s5869_s29, %s5862_s22 }
  0xf3   : > { %p5865_p3 = pnand %p5863_p5, %p6304_p13 }
  0xf4   : > { %p5872_p4 = por %p5871_p10, %p5870_p7 }
  0xf5   : > { %p5866_p2 = pneg %p5865_p3 }
  0xf7   : > { %p5873_p8 = pnand %p5872_p4, %p5866_p2 }
  0xf9   : > { %5876 = shalt.err (!%p5873_p8)
}
  0xfa   : > { %5305 = dma.hbm_to_vmem [thread:$0]  (!%p6298_p12), %s6164_s20, 16, %s919_s2, [#allocation21]  }
  0xfb   : > { %s5888_s10 = scalar_lea.vmem %s943_s21, 16  ;;  %s5895_s23 = scalar_lea.vmem %s943_s21, 32 }
  0xfc   : > { %p5889_p11 = scmp.ne.s32.totalorder %s943_s21, %s5888_s10  ;;  %p5896_p9 = scmp.lt.s32.totalorder %s943_s21, %s943_s21 }
  0xfd   : > { %p5897_p1 = scmp.lt.s32.totalorder %s5895_s23, %s5888_s10 }
  0xfe   : > { %p5891_p0 = pnand %p5889_p11, %p6304_p13 }
  0xff   : > { %p5898_p5 = por %p5897_p1, %p5896_p9 }
 0x100   : > { %p5892_p6 = pneg %p5891_p0 }
 0x102   : > { %p5899_p3 = pnand %p5898_p5, %p5892_p6 }
 0x104   : > { %5902 = shalt.err (!%p5899_p3)
}
 0x105   : > { %s6866_s18 = sld [smem:[#allocation44_spill]]  ;;  %s6074_s28 = smov [#allocation26]  }
 0x106   : > { %s958_s26 = sshll.u32 %s6074_s28, 4  ;;  %s959_s26 = int_to_ptr.vmem [resolvable:$true] %s958_s26 }
 0x107   : > { %s5914_s2 = scalar_lea.vmem %s959_s26, 512  ;;  %p5922_p4 = scmp.lt.s32.totalorder %s959_s26, %s959_s26 }
 0x108   : > { %p5915_p2 = scmp.ne.s32.totalorder %s959_s26, %s5914_s2  ;;  %p5923_p8 = scmp.lt.s32.totalorder %s5914_s2, %s5914_s2 }
 0x10a   : > { %p5917_p7 = pnand %p5915_p2, %p6304_p13  ;;  %p5924_p11 = por %p5923_p8, %p5922_p4 }
 0x10b   : > { %5311 = dma.hbm_to_vmem [thread:$0]  (!%p6298_p12), %s6866_s18, 16, %s943_s21, [#allocation24]  }
 0x10c   : > { %p5918_p10 = pneg %p5917_p7 }
 0x10e   : > { %p5925_p0 = pnand %p5924_p11, %p5918_p10 }
 0x110   : > { %5928 = shalt.err (!%p5925_p0)
}
 0x111   : > { %s6867_s22 = smov 8   ;;  %s6868_s29 = smov 128  }
 0x112   : > { %s6869_s10 = sld [smem:[#allocation47_spill]]  ;;  %p6870_p6 = scmp.ne.s32.totalorder %s6861_s11, 0 }
 0x113   : > { %p6871_p9 = scmp.eq.s32.totalorder (!%p6870_p6), %s6262_s0, 0 }
 0x114   : > { %1025 = sbr.rel (%p6870_p6) target bundleno = 6113 (0x17e1), region = 140 }
 0x118   : > { %5314 = dma.hbm_to_vmem [thread:$0]  (!%p6298_p12), %s6869_s10, 512, %s959_s26, [#allocation27], %s6868_s29, %s6868_s29, %s6867_s22  }
 0x119   : > { %5972 = dma.done.wait (%p6871_p9), [#allocation3], 256   ;;  %p6872_p13 = pmov %p6871_p9 }
 0x11a   : > { %p6873_p1 = pmov %p6871_p9 }
 0x11b   : > { %5974 = vsyncadd (%p6872_p13), [#allocation3], 4294967040 }
 0x11c   : > { %5976 = dma.done.wait (%p6873_p1), [#allocation6], 528   ;;  %p6874_p5 = pmov %p6873_p1 }
 0x11d   : > { %p6875_p3 = pmov %p6873_p1 }
 0x11e   : > { %5978 = vsyncadd (%p6874_p5), [#allocation6], 4294966768 }
 0x11f   : > { %5980 = dma.done.wait (%p6875_p3), [#allocation9], 528   ;;  %p6876_p12 = pmov %p6873_p1 }
 0x120   : > { %p6877_p2 = pmov %p6873_p1 }
 0x121   : > { %5982 = vsyncadd (%p6876_p12), [#allocation9], 4294966768 }
 0x122   : > { %5984 = dma.done.wait (%p6877_p2), [#allocation12], 528   ;;  %p6878_p7 = pmov %p6873_p1 }
 0x123   : > { %p6879_p10 = pmov %p6873_p1 }
 0x124   : > { %5986 = vsyncadd (%p6878_p7), [#allocation12], 4294966768 }
 0x125   : > { %5988 = dma.done.wait (%p6879_p10), [#allocation15], 528   ;;  %p6880_p4 = pmov %p6873_p1 }
 0x126   : > { %p6881_p8 = pmov %p6873_p1 }
 0x127   : > { %5990 = vsyncadd (%p6880_p4), [#allocation15], 4294966768 }
 0x128   : > { %5992 = dma.done.wait (%p6881_p8), [#allocation18], 528   ;;  %p6882_p11 = pmov %p6873_p1 }
 0x129   : > { %p6883_p0 = pmov %p6873_p1 }
 0x12a   : > { %5994 = vsyncadd (%p6882_p11), [#allocation18], 4294966768 }
 0x12b   : > { %5996 = dma.done.wait (%p6883_p0), [#allocation21], 528   ;;  %p6884_p6 = pmov %p6883_p0 }
 0x12c   : > { %p6885_p9 = pmov %p6883_p0 }
 0x12d   : > { %5998 = vsyncadd (%p6884_p6), [#allocation21], 4294966768 }
 0x12e   : > { %6000 = dma.done.wait (%p6885_p9), [#allocation24], 528   ;;  %p6886_p13 = pmov %p6883_p0 }
 0x12f   : > { %p6887_p1 = pmov %p6883_p0 }
 0x130   : > { %6002 = vsyncadd (%p6886_p13), [#allocation24], 4294966768 }
 0x131   : > { %6004 = dma.done.wait (%p6887_p1), [#allocation27], 512   ;;  %p6888_p5 = pmov %p6883_p0 }
 0x132   : > { %s6889_s15 = sld [smem:[#allocation39_spill]]  ;;  %p1173_p3 = scmp.lt.s32.totalorder %s6262_s0, 1  ;;  %v1208_v0 = vld [vmem:[#allocation8 + $0x18] sm:$0xff]  ;;  %v1207_v1 = vld [vmem:[#allocation8 + $0x10] sm:$0xff]  ;;  %v1206_v3 = vld [vmem:[#allocation8 + $0x8] sm:$0xff]  ;;  %vm1226_vm0 = vcmask 261120  }
 0x133   : > { %6006 = vsyncadd (%p6888_p5), [#allocation27], 4294966784  ;;  %s6890_s11 = sld [smem:[#allocation41_spill]]  ;;  %v1203_v2 = vld [vmem:[#allocation5 + $0x18] sm:$0xff]  ;;  %4963 = vmatprep.subr.mxu1 %v1208_v0  ;;  %v1202_v4 = vld [vmem:[#allocation5 + $0x10] sm:$0xff]  ;;  %vm1489_vm1 = vcmask 64512  }
 0x134   : > { %s1174_s1 = scalar_select %p1173_p3, %s6262_s0, 1  ;;  %4952 = vmatprep.subr.mxu0 %v1203_v2  ;;  %4964 = vmatpush3.msra.mxu1 %v1208_v0  ;;  %v1201_v5 = vld [vmem:[#allocation5 + $0x8] sm:$0xff]  ;;  %v6466_v12 = vld [vmem:[#allocation2] sm:$0xff]  ;;  %v6468_v13 = vld [vmem:[#allocation2 + $0x8] sm:$0xff]  ;;  %vm1579_vm2 = vcmask 130048   ;;  %vm4249_vm3 = vcmask 523264  }
 0x135   : > { %4953 = vmatpush3.msra.mxu0 %v1203_v2  ;;  %4965 = vmatprep.subr.mxu1 %v1207_v1  ;;  %v1205_v10 = vld [vmem:[#allocation8] sm:$0xff]  ;;  %v4707_v23 = vld [vmem:[#allocation7] ss:$0 sm:$0xff]  ;;  %v1212_v29 = vld [vmem:[#allocation11 + $0x10] sm:$0xff]  ;;  %s6075_s28 = smov 120   ;;  %s6076_s26 = smov 112  }
 0x136   : > { %s6455_s21 = sshll.u32 %s1174_s1, 4  ;;  %4954 = vmatprep.subr.mxu0 %v1202_v4  ;;  %4966 = vmatpush3.msra.mxu1 %v1207_v1  ;;  %v1200_v15 = vld [vmem:[#allocation5] sm:$0xff]  ;;  %v1211_v30 = vld [vmem:[#allocation11 + $0x8] sm:$0xff]  ;;  %s6077_s2 = smov 104  }
 0x137   : > { %4955 = vmatpush3.msra.mxu0 %v1202_v4  ;;  %4967 = vmatprep.subr.mxu1 %v1206_v3  ;;  %v4710_v18 = vld [vmem:[#allocation10] ss:$0 sm:$0xff]  ;;  %v1210_v31 = vld [vmem:[#allocation11] sm:$0xff]  ;;  %s6891_s22 = sld [smem:[#allocation40_spill]]  ;;  %p6900_p2 = scmp.ne.s32.totalorder %s6858_s7, 0 }
 0x138   : > { %s1177_s23 = scalar_lea.vmem %s6889_s15, %s6455_s21  ;;  %4956 = vmatprep.subr.mxu0 %v1201_v5  ;;  %4968 = vmatpush3.msra.mxu1 %v1206_v3  ;;  %v1213_v28 = vld [vmem:[#allocation11 + $0x18] sm:$0xff]  ;;  %v4713_v49 = vld [vmem:[#allocation13] ss:$0 sm:$0xff]  ;;  %v1215_v53 = vld [vmem:[#allocation14] sm:$0xff]  ;;  %s6892_s10 = sld [smem:[#allocation51_spill]] }
 0x139   : > { %s1187_s18 = scalar_lea.vmem %s6890_s11, %s6455_s21  ;;  %v1188_v6 = vld [vmem:[%s1177_s23] sm:$0xff]  ;;  %v1189_v7 = vld [vmem:[%s1177_s23 + $0x8] sm:$0xff]  ;;  %4969 = vmatprep.subr.mxu1 %v1205_v10  ;;  %4957 = vmatpush3.msra.mxu0 %v1201_v5  ;;  %s6893_s15 = sld [smem:[#allocation52_spill]] }
 0x13a   : > { %v6461_v8 = vld [vmem:[%s1187_s18] sm:$0xff]  ;;  %v6463_v9 = vld [vmem:[%s1187_s18 + $0x8] sm:$0xff]  ;;  %4970 = vmatpush3.msra.mxu1 %v1205_v10  ;;  %4958 = vmatprep.subr.mxu0 %v1200_v15  ;;  %s6894_s11 = sld [smem:[#allocation45_spill]] }
 0x13b   : > { %v1198_v11 = vadd.f32 %v6461_v8, %v1188_v6  ;;  %v1199_v14 = vadd.f32 %v6463_v9, %v1189_v7  ;;  %v1196_v16 = vadd.f32 %v6466_v12, %v6461_v8  ;;  %v1197_v17 = vadd.f32 %v6468_v13, %v6463_v9  ;;  %4959 = vmatpush3.msra.mxu0 %v1200_v15  ;;  %s6895_s1 = sld [smem:[#allocation46_spill]] }
 0x13c   : > { %4974 = vmatprep.subr.mxu0 %v1213_v28  ;;  %s6897_s23 = sld [smem:[#allocation53_spill]] }
 0x13d   : > { %4971 = vmatprep.mubr.msk.f32.mxu1 %vm1226_vm0, %v1198_v11  ;;  %4960 = vmatprep.mubr.msk.f32.mxu0 %vm1226_vm0, %v1196_v16  ;;  %s1182_s29 = scalar_lea.vmem %s6891_s22, %s6455_s21  ;;  %s6896_s21 = sld [smem:[#allocation49_spill]] }
 0x13e   : > { %4972 = vmatmul.mubr.msk.f32.vlgmr.msra.gmra.mxu1 %vm1226_vm0, %v1199_v14  ;;  %4961 = vmatmul.mubr.msk.f32.vlgmr.msra.gmra.mxu0 %vm1226_vm0, %v1197_v17  ;;  %s6898_s18 = sld [smem:[#allocation48_spill]]  ;;  %s4811_s22 = sshll.u32 %s6262_s0, 8 }
 0x13f   : > { %4982 = vmatprep.mubr.msk.f32.mxu0 %vm1226_vm0, %v1188_v6  ;;  %4975 = vmatpush3.msra.mxu0 %v1213_v28  ;;  %s6078_s0 = smov [#allocation28]  }
 0x140   : > { %4976 = vmatprep.subr.mxu0 %v1212_v29 }
 0x141   : > { %4977 = vmatpush3.msra.mxu0 %v1212_v29 }
 0x142   : > { %4978 = vmatprep.subr.mxu0 %v1211_v30 }
 0x143   : > { %4979 = vmatpush3.msra.mxu0 %v1211_v30 }
 0x144   : > { %4980 = vmatprep.subr.mxu0 %v1210_v31 }
 0x145   : > { %4981 = vmatpush3.msra.mxu0 %v1210_v31 }
 0x146   : > { %4983 = vmatmul.mubr.msk.f32.vlgmr.msra.gmra.mxu0 %vm1226_vm0, %v1189_v7 }
 0x1fe   : > { %v4973_v19 = vpop.f32.mrf.mxu1  ;;  %v4962_v22 = vpop.f32.mrf.mxu0 }
 0x1ff   : > { %v6480_v20 = vadd.f32 %v4973_v19, %v4710_v18  ;;  %v6496_v27 = vadd.f32 %v4962_v22, %v4707_v23 }
 0x200   : > { %v1386_v21 = vpop.f32.mrf.mxu1  ;;  %v1299_v25 = vpop.f32.mrf.mxu0 }
 0x201   : > { %v6482_v24 = vadd.f32 %v4710_v18, %v1386_v21  ;;  %4985 = vmatprep.subr.msk.mxu1 %vm1489_vm1, %v6480_v20  ;;  %v6488_v26 = vadd.f32 %v4707_v23, %v1299_v25 }
 0x202   : > { %4986 = vmatpush3.xpose.msk.msra.mxu1 %vm1489_vm1, %v6480_v20 }
 0x203   : > { %4987 = vmatprep.subr.msk.mxu1 %vm1489_vm1, %v6482_v24  ;;  %4989 = vmatprep.mubr.msk.f32.mxu1 %vm1489_vm1, %v6488_v26 }
 0x206   : > { %4988 = vmatpush3.xpose.msk.msra.mxu1 %vm1489_vm1, %v6482_v24  ;;  %v4984_v48 = vpop.f32.mrf.mxu0 }
 0x207   : > { %v6511_v50 = vadd.f32 %v4984_v48, %v4713_v49 }
 0x208   : > { %v1473_v51 = vpop.f32.mrf.mxu0 }
 0x209   : > { %4990 = vmatmul.mubr.msk.f32.vlgmr.msra.gmra.mxu1 %vm1489_vm1, %v6496_v27  ;;  %v6513_v52 = vadd.f32 %v4713_v49, %v1473_v51  ;;  %4992 = vmatprep.subr.mxu0 %v6511_v50 }
 0x20a   : > { %4993 = vmatpush3.msra.mxu0 %v6511_v50 }
 0x20b   : > { %4994 = vmatprep.subr.mxu0 %v6513_v52 }
 0x20c   : > { %4995 = vmatpush3.msra.mxu0 %v6513_v52 }
 0x20d   : > { %4999 = vmatprep.subr.mxu0 %v1215_v53 }
 0x2c9   : > { %v4991_v32 = vpop.f32.mrf.mxu1 }
 0x2ca   : > { %v1578_v35 = vmul.f32 0.35355338, %v4991_v32 }
 0x2cb   : > { %v1568_v33 = vpop.f32.mrf.mxu1 }
 0x2cc   : > { %v1577_v34 = vmul.f32 0.35355338, %v1568_v33  ;;  %v1583_v37 = vsel %vm1579_vm2, %v1578_v35, -inf }
 0x2ce   : > { %v1580_v36 = vsel %vm1579_vm2, %v1577_v34, -inf }
 0x2cf   : > { %1581 = vmax.xlane.f32.xlu0 %v1580_v36 }
 0x2d3   : > { %1584 = vmax.xlane.f32.xlu0 %v1583_v37 }
 0x2e9   : > { %1772 = vrot.lane.b32.xlu0 %v6480_v20, %s6075_s28 }
 0x2ed   : > { %2059 = vrot.lane.b32.xlu0 %v6480_v20, %s6076_s26 }
 0x2f1   : > { %2053 = vrot.lane.b32.xlu0 %v6488_v26, %s6076_s26 }
 0x358   : > { %v1582_v38 = vpop.xlane.xlu0 %1581 }
 0x359   : > { %v1586_v39 = vsub.f32 %v1577_v34, %v1582_v38 }
 0x35b   : > { %v1588_v40 = vmul.f32 1.442695, %v1586_v39 }
 0x35c   : > { %v1585_v41 = vpop.xlane.xlu0 %1584 }
 0x35d   : > { %5437 = vpow2.f32 %v1588_v40  ;;  %v1587_v42 = vsub.f32 %v1578_v35, %v1585_v41 }
 0x35f   : > { %v1590_v43 = vmul.f32 1.442695, %v1587_v42 }
 0x360   : > { %v1773_v60 = vpop.permute.xlu0 %1772 }
 0x361   : > { %5439 = vpow2.f32 %v1590_v43 }
 0x364   : > { %v2060_v1 = vpop.permute.xlu0 %2059 }
 0x368   : > { %v2054_v3 = vpop.permute.xlu0 %2053 }
 0x36a   : > { %v5438_v44 = vpop.eup %5437 }
 0x36b   : > { %v1592_v45 = vsel %vm1579_vm2, %v5438_v44, 0.0 }
 0x36c   : > { %1593 = vadd.xlane.f32.xlu1 %v1592_v45 }
 0x36e   : > { %v5440_v46 = vpop.eup %5439 }
 0x36f   : > { %v1595_v47 = vsel %vm1579_vm2, %v5440_v46, 0.0 }
 0x370   : > { %1596 = vadd.xlane.f32.xlu1 %v1595_v47 }
 0x381   : > { %1770 = vrot.lane.b32.xlu1 %v6482_v24, %s6075_s28 }
 0x385   : > { %1766 = vrot.lane.b32.xlu1 %v6488_v26, %s6075_s28 }
 0x389   : > { %1768 = vrot.lane.b32.xlu1 %v6496_v27, %s6075_s28 }
 0x38d   : > { %2057 = vrot.lane.b32.xlu1 %v6482_v24, %s6076_s26 }
 0x391   : > { %2055 = vrot.lane.b32.xlu1 %v6496_v27, %s6076_s26 }
 0x3f5   : > { %v1594_v54 = vpop.xlane.xlu1 %1593 }
 0x3f6   : > { %5441 = vrcp.f32 %v1594_v54 }
 0x3f9   : > { %v1597_v55 = vpop.xlane.xlu1 %1596 }
 0x3fa   : > { %5443 = vrcp.f32 %v1597_v55 }
 0x3fd   : > { %v1771_v61 = vpop.permute.xlu1 %1770 }
 0x401   : > { %v1767_v63 = vpop.permute.xlu1 %1766 }
 0x403   : > { %v5442_v56 = vpop.eup %5441 }
 0x404   : > { %v1600_v57 = vmul.f32 %v5442_v56, %v5438_v44 }
 0x405   : > { %v1769_v2 = vpop.permute.xlu1 %1768 }
 0x406   : > { %4996 = vmatprep.mubr.msk.f32.mxu0 %vm1579_vm2, %v1600_v57 }
 0x407   : > { %v5444_v58 = vpop.eup %5443 }
 0x408   : > { %v1601_v59 = vmul.f32 %v5444_v58, %v5440_v46  ;;  %v1216_v58 = vld [vmem:[#allocation14 + $0x8] sm:$0xff] }
 0x409   : > { %v2058_v4 = vpop.permute.xlu1 %2057 }
 0x40a   : > { %4997 = vmatmul.mubr.msk.f32.vlgmr.msra.gmra.mxu0 %vm1579_vm2, %v1601_v59 }
 0x40b   : > { %5000 = vmatpush3.msra.mxu0 %v1215_v53 }
 0x40c   : > { %5004 = vmatprep.subr.msk.mxu0 %vm1489_vm1, %v1773_v60 }
 0x40d   : > { %v2056_v5 = vpop.permute.xlu1 %2055 }
 0x4ca   : > { %v4998_v62 = vpop.f32.mrf.mxu0 }
 0x4cc   : > { %v1674_v0 = vpop.f32.mrf.mxu0 }
 0x4cd   : > { %5001 = vmatprep.mubr.msk.f32.mxu0 %vm1489_vm1, %v1674_v0 }
 0x4ce   : > { %5002 = vmatmul.mubr.msk.f32.vlgmr.msra.gmra.mxu0 %vm1489_vm1, %v4998_v62 }
 0x4cf   : > { %5005 = vmatpush3.xpose.msk.msra.mxu0 %vm1489_vm1, %v1773_v60  ;;  %5008 = vmatprep.mubr.msk.f32.mxu0 %vm1489_vm1, %v1767_v63 }
 0x4d0   : > { %5006 = vmatprep.subr.msk.mxu0 %vm1489_vm1, %v1771_v61 }
 0x4d3   : > { %5007 = vmatpush3.xpose.msk.msra.mxu0 %vm1489_vm1, %v1771_v61 }
 0x4d4   : > { %5023 = vmatprep.subr.msk.mxu0 %vm1489_vm1, %v2060_v1 }
 0x4d6   : > { %5009 = vmatmul.mubr.msk.f32.vlgmr.msra.gmra.mxu0 %vm1489_vm1, %v1769_v2 }
 0x4d7   : > { %5024 = vmatpush3.xpose.msk.msra.mxu0 %vm1489_vm1, %v2060_v1  ;;  %5027 = vmatprep.mubr.msk.f32.mxu0 %vm1489_vm1, %v2054_v3 }
 0x4d8   : > { %5025 = vmatprep.subr.msk.mxu0 %vm1489_vm1, %v2058_v4 }
 0x4db   : > { %5026 = vmatpush3.xpose.msk.msra.mxu0 %vm1489_vm1, %v2058_v4 }
 0x4de   : > { %5028 = vmatmul.mubr.msk.f32.vlgmr.msra.gmra.mxu0 %vm1489_vm1, %v2056_v5 }
 0x58e   : > { %v6545_v6 = vpop.f32.mrf.mxu0 }
 0x590   : > { %v6547_v7 = vpop.f32.mrf.mxu0 }
 0x596   : > { %v5010_v10 = vpop.f32.mrf.mxu0 }
 0x597   : > { %v1858_v11 = vmul.f32 0.35355338, %v5010_v10 }
 0x598   : > { %v1848_v14 = vpop.f32.mrf.mxu0 }
 0x599   : > { %v1857_v15 = vmul.f32 0.35355338, %v1848_v14  ;;  %v1862_v16 = vsel %vm1579_vm2, %v1858_v11, -inf }
 0x59a   : > { %1863 = vmax.xlane.f32.xlu1 %v1862_v16 }
 0x59b   : > { %v1859_v17 = vsel %vm1579_vm2, %v1857_v15, -inf }
 0x59c   : > { %1860 = vmax.xlane.f32.xlu0 %v1859_v17  ;;  %v1217_v17 = vld [vmem:[#allocation14 + $0x10] sm:$0xff] }
 0x59e   : > { %v5029_v18 = vpop.f32.mrf.mxu0 }
 0x59f   : > { %v2145_v19 = vmul.f32 0.35355338, %v5029_v18 }
 0x5a0   : > { %v2135_v39 = vpop.f32.mrf.mxu0 }
 0x5a1   : > { %v2149_v21 = vsel %vm1579_vm2, %v2145_v19, -inf  ;;  %v2144_v40 = vmul.f32 0.35355338, %v2135_v39 }
 0x5a3   : > { %v2146_v41 = vsel %vm1579_vm2, %v2144_v40, -inf }
 0x5ab   : > { %1883 = vrot.lane.b32.xlu1 %v6513_v52, %s6075_s28 }
 0x5af   : > { %2344 = vrot.lane.b32.xlu1 %v6480_v20, %s6077_s2 }
 0x5b3   : > { %2342 = vrot.lane.b32.xlu1 %v6482_v24, %s6077_s2 }
 0x5b7   : > { %2340 = vrot.lane.b32.xlu1 %v6496_v27, %s6077_s2 }
 0x5db   : > { %2150 = vmax.xlane.f32.xlu1 %v2149_v21 }
 0x5ec   : > { %2168 = vrot.lane.b32.xlu1 %v6513_v52, %s6076_s26 }
 0x623   : > { %v1864_v22 = vpop.xlane.xlu1 %1863 }
 0x624   : > { %v1866_v23 = vsub.f32 %v1858_v11, %v1864_v22 }
 0x625   : > { %v1861_v25 = vpop.xlane.xlu0 %1860 }
 0x626   : > { %v1869_v28 = vmul.f32 1.442695, %v1866_v23  ;;  %v1865_v29 = vsub.f32 %v1857_v15, %v1861_v25 }
 0x627   : > { %v1884_v20 = vpop.permute.xlu1 %1883 }
 0x628   : > { %5445 = vpow2.f32 %v1869_v28  ;;  %v1867_v30 = vmul.f32 1.442695, %v1865_v29 }
 0x62a   : > { %5447 = vpow2.f32 %v1867_v30 }
 0x62b   : > { %v2345_v24 = vpop.permute.xlu1 %2344 }
 0x62c   : > { %5042 = vmatprep.subr.msk.mxu0 %vm1489_vm1, %v2345_v24 }
 0x62d   : > { %5043 = vmatpush3.xpose.msk.msra.mxu0 %vm1489_vm1, %v2345_v24  ;;  %v4716_v24 = vld [vmem:[#allocation16] ss:$0 sm:$0xff] }
 0x62f   : > { %v2343_v27 = vpop.permute.xlu1 %2342 }
 0x630   : > { %5044 = vmatprep.subr.msk.mxu0 %vm1489_vm1, %v2343_v27 }
 0x631   : > { %5045 = vmatpush3.xpose.msk.msra.mxu0 %vm1489_vm1, %v2343_v27  ;;  %v1765_v27 = vadd.f32 %v6545_v6, %v4716_v24  ;;  %v1218_v6 = vld [vmem:[#allocation14 + $0x18] sm:$0xff] }
 0x633   : > { %v2341_v35 = vpop.permute.xlu1 %2340 }
 0x635   : > { %v5446_v31 = vpop.eup %5445 }
 0x636   : > { %v1874_v32 = vsel %vm1579_vm2, %v5446_v31, 0.0 }
 0x637   : > { %v5448_v33 = vpop.eup %5447  ;;  %1875 = vadd.xlane.f32.xlu0 %v1874_v32  ;;  %v1764_v32 = vadd.f32 %v4716_v24, %v6547_v7 }
 0x638   : > { %v1871_v34 = vsel %vm1579_vm2, %v5448_v33, 0.0 }
 0x63b   : > { %1872 = vadd.xlane.f32.xlu0 %v1871_v34 }
 0x651   : > { %1885 = vrot.lane.b32.xlu0 %v6511_v50, %s6075_s28 }
 0x655   : > { %2338 = vrot.lane.b32.xlu0 %v6488_v26, %s6077_s2 }
 0x664   : > { %v2151_v36 = vpop.xlane.xlu1 %2150 }
 0x665   : > { %v2153_v37 = vsub.f32 %v2145_v19, %v2151_v36 }
 0x667   : > { %v2156_v38 = vmul.f32 1.442695, %v2153_v37 }
 0x668   : > { %v2169_v10 = vpop.permute.xlu1 %2168 }
 0x669   : > { %5449 = vpow2.f32 %v2156_v38 }
 0x674   : > { %2147 = vmax.xlane.f32.xlu0 %v2146_v41 }
 0x676   : > { %v5450_v42 = vpop.eup %5449 }
 0x677   : > { %v2161_v43 = vsel %vm1579_vm2, %v5450_v42, 0.0 }
 0x678   : > { %2162 = vadd.xlane.f32.xlu0 %v2161_v43 }
 0x6c0   : > { %v1876_v44 = vpop.xlane.xlu0 %1875 }
 0x6c1   : > { %5451 = vrcp.f32 %v1876_v44 }
 0x6c4   : > { %v1873_v45 = vpop.xlane.xlu0 %1872 }
 0x6c5   : > { %5453 = vrcp.f32 %v1873_v45 }
 0x6c8   : > { %v1886_v46 = vpop.permute.xlu0 %1885 }
 0x6c9   : > { %5011 = vmatprep.subr.mxu1 %v1886_v46 }
 0x6ca   : > { %5012 = vmatpush3.msra.mxu1 %v1886_v46 }
 0x6cb   : > { %5013 = vmatprep.subr.mxu1 %v1884_v20 }
 0x6cc   : > { %5014 = vmatpush3.msra.mxu1 %v1884_v20  ;;  %v2339_v26 = vpop.permute.xlu0 %2338 }
 0x6cd   : > { %5046 = vmatprep.mubr.msk.f32.mxu0 %vm1489_vm1, %v2339_v26  ;;  %5018 = vmatprep.subr.mxu1 %v1216_v58 }
 0x6ce   : > { %5047 = vmatmul.mubr.msk.f32.vlgmr.msra.gmra.mxu0 %vm1489_vm1, %v2341_v35  ;;  %v5452_v47 = vpop.eup %5451 }
 0x6cf   : > { %v1880_v51 = vmul.f32 %v5452_v47, %v5446_v31 }
 0x6d2   : > { %v5454_v48 = vpop.eup %5453 }
 0x6d3   : > { %v1879_v49 = vmul.f32 %v5454_v48, %v5448_v33 }
 0x6d5   : > { %5015 = vmatprep.mubr.msk.f32.mxu1 %vm1579_vm2, %v1879_v49 }
 0x6d6   : > { %5016 = vmatmul.mubr.msk.f32.vlgmr.msra.gmra.mxu1 %vm1579_vm2, %v1880_v51 }
 0x6d7   : > { %5019 = vmatpush3.msra.mxu1 %v1216_v58 }
 0x6fd   : > { %v2148_v53 = vpop.xlane.xlu0 %2147 }
 0x6fe   : > { %v2152_v54 = vsub.f32 %v2144_v40, %v2148_v53 }
 0x700   : > { %v2154_v55 = vmul.f32 1.442695, %v2152_v54 }
 0x701   : > { %v2163_v1 = vpop.xlane.xlu0 %2162 }
 0x702   : > { %5455 = vpow2.f32 %v2154_v55 }
 0x703   : > { %5457 = vrcp.f32 %v2163_v1 }
 0x70f   : > { %v5456_v56 = vpop.eup %5455 }
 0x710   : > { %v2158_v57 = vsel %vm1579_vm2, %v5456_v56, 0.0  ;;  %v5458_v11 = vpop.eup %5457 }
 0x711   : > { %2159 = vadd.xlane.f32.xlu0 %v2158_v57  ;;  %v2167_v16 = vmul.f32 %v5458_v11, %v5450_v42  ;;  %v2680_v11 = vld [vmem:[#allocation20 + $0x8] sm:$0xff] }
 0x727   : > { %2170 = vrot.lane.b32.xlu0 %v6511_v50, %s6076_s26 }
 0x78e   : > { %v5048_v59 = vpop.f32.mrf.mxu0 }
 0x78f   : > { %v2430_v60 = vmul.f32 0.35355338, %v5048_v59 }
 0x790   : > { %v2420_v61 = vpop.f32.mrf.mxu0 }
 0x791   : > { %v2429_v62 = vmul.f32 0.35355338, %v2420_v61  ;;  %v2434_v63 = vsel %vm1579_vm2, %v2430_v60, -inf }
 0x792   : > { %2435 = vmax.xlane.f32.xlu0 %v2434_v63 }
 0x793   : > { %v2431_v0 = vsel %vm1579_vm2, %v2429_v62, -inf }
 0x794   : > { %2432 = vmax.xlane.f32.xlu1 %v2431_v0 }
 0x796   : > { %v5017_v2 = vpop.f32.mrf.mxu1 }
 0x798   : > { %v1961_v3 = vpop.f32.mrf.mxu1 }
 0x799   : > { %5020 = vmatprep.mubr.msk.f32.mxu1 %vm1489_vm1, %v1961_v3  ;;  %v2681_v3 = vld [vmem:[#allocation20 + $0x10] sm:$0xff] }
 0x79a   : > { %5021 = vmatmul.mubr.msk.f32.vlgmr.msra.gmra.mxu1 %vm1489_vm1, %v5017_v2  ;;  %v2160_v4 = vpop.xlane.xlu0 %2159 }
 0x79b   : > { %5459 = vrcp.f32 %v2160_v4  ;;  %v1190_v4 = vld [vmem:[%s1182_s29] sm:$0xff] }
 0x79e   : > { %v2171_v5 = vpop.permute.xlu0 %2170 }
 0x79f   : > { %5030 = vmatprep.subr.mxu1 %v2171_v5 }
 0x7a0   : > { %5031 = vmatpush3.msra.mxu1 %v2171_v5  ;;  %v2677_v5 = vld [vmem:[#allocation17 + $0x18] sm:$0xff] }
 0x7a1   : > { %5032 = vmatprep.subr.mxu1 %v2169_v10  ;;  %5061 = vmatprep.subr.mxu0 %v2677_v5 }
 0x7a2   : > { %5033 = vmatpush3.msra.mxu1 %v2169_v10  ;;  %v6609_v10 = vld [vmem:[%s1182_s29 + $0x8] sm:$0xff]  ;;  %5062 = vmatpush3.msra.mxu0 %v2677_v5 }
 0x7a3   : > { %5037 = vmatprep.subr.mxu1 %v1217_v17 }
 0x7a8   : > { %v5460_v14 = vpop.eup %5459 }
 0x7a9   : > { %v2166_v15 = vmul.f32 %v5460_v14, %v5456_v56  ;;  %v2672_v14 = vadd.f32 %v6461_v8, %v1190_v4 }
 0x7ab   : > { %5034 = vmatprep.mubr.msk.f32.mxu1 %vm1579_vm2, %v2166_v15  ;;  %v2676_v15 = vld [vmem:[#allocation17 + $0x10] sm:$0xff] }
 0x7ac   : > { %5035 = vmatmul.mubr.msk.f32.vlgmr.msra.gmra.mxu1 %vm1579_vm2, %v2167_v16  ;;  %v2679_v16 = vld [vmem:[#allocation20] sm:$0xff]  ;;  %5063 = vmatprep.subr.mxu0 %v2676_v15 }
 0x7ad   : > { %5038 = vmatpush3.msra.mxu1 %v1217_v17  ;;  %v2675_v17 = vld [vmem:[#allocation17 + $0x8] sm:$0xff]  ;;  %5064 = vmatpush3.msra.mxu0 %v2676_v15 }
 0x7ae   : > { %5065 = vmatprep.subr.mxu0 %v2675_v17 }
 0x7af   : > { %5066 = vmatpush3.msra.mxu0 %v2675_v17 }
 0x81b   : > { %v2436_v18 = vpop.xlane.xlu0 %2435 }
 0x81c   : > { %v2438_v19 = vsub.f32 %v2430_v60, %v2436_v18  ;;  %v2673_v18 = vadd.f32 %v6463_v9, %v6609_v10 }
 0x81d   : > { %v2433_v21 = vpop.xlane.xlu1 %2432 }
 0x81e   : > { %v2441_v22 = vmul.f32 1.442695, %v2438_v19  ;;  %v2437_v23 = vsub.f32 %v2429_v62, %v2433_v21  ;;  %v2674_v19 = vld [vmem:[#allocation17] sm:$0xff] }
 0x81f   : > { %5067 = vmatprep.subr.mxu0 %v2674_v19 }
 0x820   : > { %5461 = vpow2.f32 %v2441_v22  ;;  %v2439_v25 = vmul.f32 1.442695, %v2437_v23  ;;  %5068 = vmatpush3.msra.mxu0 %v2674_v19 }
 0x822   : > { %5463 = vpow2.f32 %v2439_v25 }
 0x82d   : > { %v5462_v28 = vpop.eup %5461 }
 0x82e   : > { %v2446_v29 = vsel %vm1579_vm2, %v5462_v28, 0.0 }
 0x82f   : > { %v5464_v20 = vpop.eup %5463  ;;  %2447 = vadd.xlane.f32.xlu1 %v2446_v29 }
 0x830   : > { %v2443_v30 = vsel %vm1579_vm2, %v5464_v20, 0.0 }
 0x831   : > { %2444 = vadd.xlane.f32.xlu0 %v2443_v30  ;;  %v4749_v30 = vld [vmem:[%s6892_s10] ss:$0 sm:$0xff] }
 0x840   : > { %2453 = vrot.lane.b32.xlu1 %v6513_v52, %s6077_s2 }
 0x847   : > { %2455 = vrot.lane.b32.xlu0 %v6511_v50, %s6077_s2 }
 0x85a   : > { %v5022_v31 = vpop.f32.mrf.mxu1 }
 0x85b   : > { %v2052_v33 = vadd.f32 %v5022_v31, %v1765_v27  ;;  %v4750_v31 = vld [vmem:[%s6893_s15] ss:$0 sm:$0xff]  ;;  %s6782_s15 = scalar_lea.hbm %s6239_s9, %s4811_s22 }
 0x85c   : > { %v2042_v34 = vpop.f32.mrf.mxu1 }
 0x85d   : > { %v2051_v35 = vadd.f32 %v2042_v34, %v1764_v32 }
 0x86c   : > { %v5036_v36 = vpop.f32.mrf.mxu1 }
 0x86e   : > { %v2246_v37 = vpop.f32.mrf.mxu1 }
 0x86f   : > { %5039 = vmatprep.mubr.msk.f32.mxu1 %vm1489_vm1, %v2246_v37 }
 0x870   : > { %5040 = vmatmul.mubr.msk.f32.vlgmr.msra.gmra.mxu1 %vm1489_vm1, %v5036_v36 }
 0x8b8   : > { %v2448_v38 = vpop.xlane.xlu1 %2447 }
 0x8b9   : > { %5465 = vrcp.f32 %v2448_v38 }
 0x8ba   : > { %v2445_v52 = vpop.xlane.xlu0 %2444 }
 0x8bb   : > { %5467 = vrcp.f32 %v2445_v52  ;;  %v4754_v52 = vld [vmem:[#allocation22] ss:$0 sm:$0xff] }
 0x8bc   : > { %v2454_v39 = vpop.permute.xlu1 %2453 }
 0x8be   : > { %v2456_v50 = vpop.permute.xlu0 %2455 }
 0x8bf   : > { %5049 = vmatprep.subr.mxu1 %v2456_v50 }
 0x8c0   : > { %5050 = vmatpush3.msra.mxu1 %v2456_v50 }
 0x8c1   : > { %5051 = vmatprep.subr.mxu1 %v2454_v39 }
 0x8c2   : > { %5052 = vmatpush3.msra.mxu1 %v2454_v39 }
 0x8c3   : > { %5056 = vmatprep.subr.mxu1 %v1218_v6 }
 0x8c6   : > { %v5466_v7 = vpop.eup %5465 }
 0x8c7   : > { %v2452_v42 = vmul.f32 %v5466_v7, %v5462_v28 }
 0x8c8   : > { %v5468_v40 = vpop.eup %5467 }
 0x8c9   : > { %v2451_v41 = vmul.f32 %v5468_v40, %v5464_v20 }
 0x8cb   : > { %5053 = vmatprep.mubr.msk.f32.mxu1 %vm1579_vm2, %v2451_v41 }
 0x8cc   : > { %5054 = vmatmul.mubr.msk.f32.vlgmr.msra.gmra.mxu1 %vm1579_vm2, %v2452_v42 }
 0x8cd   : > { %5057 = vmatpush3.msra.mxu1 %v1218_v6 }
 0x930   : > { %v5041_v43 = vpop.f32.mrf.mxu1 }
 0x931   : > { %v2337_v44 = vadd.f32 %v5041_v43, %v2052_v33  ;;  %v2687_v43 = vld [vmem:[#allocation23 + $0x18] sm:$0xff] }
 0x932   : > { %v2327_v45 = vpop.f32.mrf.mxu1  ;;  %5083 = vmatprep.subr.mxu0 %v2687_v43 }
 0x933   : > { %v2336_v48 = vadd.f32 %v2327_v45, %v2051_v35  ;;  %v2685_v45 = vld [vmem:[#allocation23 + $0x8] sm:$0xff] }
 0x98c   : > { %v5055_v46 = vpop.f32.mrf.mxu1 }
 0x98e   : > { %v2531_v26 = vpop.f32.mrf.mxu1 }
 0x98f   : > { %5058 = vmatprep.mubr.msk.f32.mxu1 %vm1489_vm1, %v2531_v26 }
 0x990   : > { %5059 = vmatmul.mubr.msk.f32.vlgmr.msra.gmra.mxu1 %vm1489_vm1, %v5055_v46  ;;  %v2684_v46 = vld [vmem:[#allocation23] sm:$0xff] }
 0x991   : > { %5080 = vmatprep.mubr.msk.f32.mxu1 %vm1226_vm0, %v2672_v14 }
 0xa50   : > { %v5060_v47 = vpop.f32.mrf.mxu1 }
 0xa51   : > { %v2622_v49 = vadd.f32 %v5060_v47, %v2337_v44  ;;  %v2686_v44 = vld [vmem:[#allocation23 + $0x10] sm:$0xff] }
 0xa52   : > { %v2612_v51 = vpop.f32.mrf.mxu1 }
 0xa53   : > { %v2621_v53 = vadd.f32 %v2612_v51, %v2336_v48  ;;  %v2624_v54 = vadd.f32 %v2622_v49, %v6468_v13 }
 0xa55   : > { %v2630_v55 = vsel %vm1226_vm0, %v2624_v54, 0.0  ;;  %v2623_v56 = vadd.f32 %v2621_v53, %v6466_v12  ;;  %v2682_v12 = vld [vmem:[#allocation20 + $0x18] sm:$0xff] }
 0xa56   : > { %2631 = vadd.xlane.f32.xlu0 %v2630_v55  ;;  %5072 = vmatprep.subr.mxu1 %v2682_v12 }
 0xa57   : > { %v2627_v57 = vsel %vm1226_vm0, %v2623_v56, 0.0  ;;  %5073 = vmatpush3.msra.mxu1 %v2682_v12 }
 0xa58   : > { %2628 = vadd.xlane.f32.xlu1 %v2627_v57  ;;  %5074 = vmatprep.subr.mxu1 %v2681_v3 }
 0xa59   : > { %5075 = vmatpush3.msra.mxu1 %v2681_v3 }
 0xa5a   : > { %5076 = vmatprep.subr.mxu1 %v2680_v11 }
 0xa5b   : > { %5077 = vmatpush3.msra.mxu1 %v2680_v11 }
 0xa5c   : > { %5078 = vmatprep.subr.mxu1 %v2679_v16 }
 0xa5d   : > { %5079 = vmatpush3.msra.mxu1 %v2679_v16 }
 0xa5e   : > { %5081 = vmatmul.mubr.msk.f32.vlgmr.msra.gmra.mxu1 %vm1226_vm0, %v2673_v18 }
 0xadf   : > { %v2632_v58 = vpop.xlane.xlu0 %2631 }
 0xae0   : > { %v2635_v59 = vmul.f32 0.03125, %v2632_v58 }
 0xae1   : > { %v2629_v60 = vpop.xlane.xlu1 %2628 }
 0xae2   : > { %v2637_v61 = vsub.f32 %v2624_v54, %v2635_v59  ;;  %v2634_v62 = vmul.f32 0.03125, %v2629_v60  ;;  %v4757_v54 = vld [vmem:[#allocation25] ss:$0 sm:$0xff] }
 0xae4   : > { %v2636_v63 = vsub.f32 %v2623_v56, %v2634_v62  ;;  %v2639_v0 = vmul.f32 %v2637_v61, %v2637_v61 }
 0xae6   : > { %v2643_v1 = vsel %vm1226_vm0, %v2639_v0, 0.0  ;;  %v2638_v13 = vmul.f32 %v2636_v63, %v2636_v63 }
 0xae7   : > { %2644 = vadd.xlane.f32.xlu1 %v2643_v1 }
 0xae8   : > { %v2640_v2 = vsel %vm1226_vm0, %v2638_v13, 0.0 }
 0xae9   : > { %2641 = vadd.xlane.f32.xlu0 %v2640_v2 }
 0xb1e   : > { %v5082_v50 = vpop.f32.mrf.mxu1 }
 0xb1f   : > { %v6629_v39 = vadd.f32 %v5082_v50, %v4754_v52 }
 0xb20   : > { %v2859_v6 = vpop.f32.mrf.mxu1 }
 0xb21   : > { %5094 = vmatprep.subr.msk.mxu1 %vm1489_vm1, %v6629_v39  ;;  %v6633_v7 = vadd.f32 %v4754_v52, %v2859_v6 }
 0xb22   : > { %5095 = vmatpush3.xpose.msk.msra.mxu1 %vm1489_vm1, %v6629_v39 }
 0xb23   : > { %5096 = vmatprep.subr.msk.mxu1 %vm1489_vm1, %v6633_v7 }
 0xb26   : > { %5097 = vmatpush3.xpose.msk.msra.mxu1 %vm1489_vm1, %v6633_v7 }
 0xb70   : > { %v2645_v21 = vpop.xlane.xlu1 %2644 }
 0xb71   : > { %v2647_v22 = vmul.f32 0.03125, %v2645_v21 }
 0xb72   : > { %v2642_v23 = vpop.xlane.xlu0 %2641 }
 0xb73   : > { %v2649_v25 = vadd.f32 1e-05, %v2647_v22  ;;  %v2646_v28 = vmul.f32 0.03125, %v2642_v23 }
 0xb75   : > { %5469 = vrsqrt.f32 %v2649_v25  ;;  %v2648_v29 = vadd.f32 1e-05, %v2646_v28  ;;  %v2689_v25 = vld [vmem:[%s6894_s11] sm:$0xff] }
 0xb76   : > { %5108 = vmatprep.subr.mxu1 %v2689_v25 }
 0xb77   : > { %5471 = vrsqrt.f32 %v2648_v29 }
 0xb82   : > { %v5470_v20 = vpop.eup %5469 }
 0xb83   : > { %v2653_v24 = vmul.f32 %v5470_v20, %v2637_v61 }
 0xb84   : > { %v5472_v27 = vpop.eup %5471 }
 0xb85   : > { %v2652_v32 = vmul.f32 %v5472_v27, %v2636_v63  ;;  %v2661_v33 = vmul.f32 %v4749_v30, %v2653_v24 }
 0xb87   : > { %v2660_v34 = vmul.f32 %v4749_v30, %v2652_v32  ;;  %v6618_v35 = vadd.f32 %v4750_v31, %v2661_v33 }
 0xb89   : > { %v6620_v36 = vadd.f32 %v4750_v31, %v2660_v34  ;;  %v2671_v38 = vadd.f32 %v6618_v35, %v6463_v9  ;;  %v4751_v9 = vld [vmem:[#allocation19] ss:$0 sm:$0xff] }
 0xb8b   : > { %v2670_v37 = vadd.f32 %v6620_v36, %v6461_v8 }
 0xb8d   : > { %5069 = vmatprep.mubr.msk.f32.mxu0 %vm1226_vm0, %v2670_v37 }
 0xb8e   : > { %5070 = vmatmul.mubr.msk.f32.vlgmr.msra.gmra.mxu0 %vm1226_vm0, %v2671_v38 }
 0xb8f   : > { %5091 = vmatprep.mubr.msk.f32.mxu0 %vm1226_vm0, %v1190_v4  ;;  %5084 = vmatpush3.msra.mxu0 %v2687_v43 }
 0xb90   : > { %5085 = vmatprep.subr.mxu0 %v2686_v44 }
 0xb91   : > { %5086 = vmatpush3.msra.mxu0 %v2686_v44 }
 0xb92   : > { %5087 = vmatprep.subr.mxu0 %v2685_v45 }
 0xb93   : > { %5088 = vmatpush3.msra.mxu0 %v2685_v45 }
 0xb94   : > { %5089 = vmatprep.subr.mxu0 %v2684_v46 }
 0xb95   : > { %5090 = vmatpush3.msra.mxu0 %v2684_v46 }
 0xb96   : > { %5092 = vmatmul.mubr.msk.f32.vlgmr.msra.gmra.mxu0 %vm1226_vm0, %v6609_v10 }
 0xc4e   : > { %v5071_v8 = vpop.f32.mrf.mxu0 }
 0xc4f   : > { %v6643_v42 = vadd.f32 %v5071_v8, %v4751_v9 }
 0xc50   : > { %v2772_v40 = vpop.f32.mrf.mxu0 }
 0xc51   : > { %v6641_v41 = vadd.f32 %v4751_v9, %v2772_v40 }
 0xc53   : > { %5098 = vmatprep.mubr.msk.f32.mxu1 %vm1489_vm1, %v6641_v41 }
 0xc54   : > { %5099 = vmatmul.mubr.msk.f32.vlgmr.msra.gmra.mxu1 %vm1489_vm1, %v6643_v42 }
 0xc55   : > { %5109 = vmatpush3.msra.mxu1 %v2689_v25 }
 0xc56   : > { %v5093_v55 = vpop.f32.mrf.mxu0 }
 0xc57   : > { %v6653_v56 = vadd.f32 %v5093_v55, %v4757_v54 }
 0xc58   : > { %v2946_v2 = vpop.f32.mrf.mxu0 }
 0xc59   : > { %5101 = vmatprep.subr.mxu0 %v6653_v56  ;;  %v6659_v12 = vadd.f32 %v4757_v54, %v2946_v2 }
 0xc5a   : > { %5102 = vmatpush3.msra.mxu0 %v6653_v56 }
 0xc5b   : > { %5103 = vmatprep.subr.mxu0 %v6659_v12 }
 0xc5c   : > { %5104 = vmatpush3.msra.mxu0 %v6659_v12 }
 0xd14   : > { %v5100_v26 = vpop.f32.mrf.mxu1 }
 0xd15   : > { %v3050_v47 = vmul.f32 0.35355338, %v5100_v26 }
 0xd16   : > { %v3040_v48 = vpop.f32.mrf.mxu1 }
 0xd17   : > { %v3049_v49 = vmul.f32 0.35355338, %v3040_v48  ;;  %v3054_v51 = vsel %vm1579_vm2, %v3050_v47, -inf }
 0xd18   : > { %3055 = vmax.xlane.f32.xlu1 %v3054_v51 }
 0xd19   : > { %v3051_v53 = vsel %vm1579_vm2, %v3049_v49, -inf }
 0xd1a   : > { %3052 = vmax.xlane.f32.xlu0 %v3051_v53 }
 0xda1   : > { %v3056_v57 = vpop.xlane.xlu1 %3055 }
 0xda2   : > { %v3058_v58 = vsub.f32 %v3050_v47, %v3056_v57 }
 0xda3   : > { %v3053_v59 = vpop.xlane.xlu0 %3052 }
 0xda4   : > { %v3061_v60 = vmul.f32 1.442695, %v3058_v58  ;;  %v3057_v61 = vsub.f32 %v3049_v49, %v3053_v59 }
 0xda6   : > { %5473 = vpow2.f32 %v3061_v60  ;;  %v3059_v62 = vmul.f32 1.442695, %v3057_v61 }
 0xda8   : > { %5475 = vpow2.f32 %v3059_v62 }
 0xdb3   : > { %v5474_v63 = vpop.eup %5473 }
 0xdb4   : > { %v3066_v0 = vsel %vm1579_vm2, %v5474_v63, 0.0 }
 0xdb5   : > { %v5476_v1 = vpop.eup %5475  ;;  %3067 = vadd.xlane.f32.xlu1 %v3066_v0 }
 0xdb6   : > { %v3063_v13 = vsel %vm1579_vm2, %v5476_v1, 0.0 }
 0xdb7   : > { %3064 = vadd.xlane.f32.xlu0 %v3063_v13 }
 0xdc6   : > { %3241 = vrot.lane.b32.xlu1 %v6633_v7, %s6075_s28 }
 0xdca   : > { %3237 = vrot.lane.b32.xlu1 %v6641_v41, %s6075_s28 }
 0xdcd   : > { %3243 = vrot.lane.b32.xlu0 %v6629_v39, %s6075_s28 }
 0xdce   : > { %3239 = vrot.lane.b32.xlu1 %v6643_v42, %s6075_s28 }
 0xdd1   : > { %3530 = vrot.lane.b32.xlu0 %v6629_v39, %s6076_s26 }
 0xdd2   : > { %3528 = vrot.lane.b32.xlu1 %v6633_v7, %s6076_s26 }
 0xdd5   : > { %3524 = vrot.lane.b32.xlu0 %v6641_v41, %s6076_s26 }
 0xdd6   : > { %3526 = vrot.lane.b32.xlu1 %v6643_v42, %s6076_s26 }
 0xe3e   : > { %v3068_v3 = vpop.xlane.xlu1 %3067 }
 0xe3f   : > { %5477 = vrcp.f32 %v3068_v3 }
 0xe40   : > { %v3065_v4 = vpop.xlane.xlu0 %3064 }
 0xe41   : > { %5479 = vrcp.f32 %v3065_v4  ;;  %v2690_v4 = vld [vmem:[%s6894_s11 + $0x8] sm:$0xff] }
 0xe42   : > { %v3242_v10 = vpop.permute.xlu1 %3241 }
 0xe44   : > { %v3244_v5 = vpop.permute.xlu0 %3243 }
 0xe45   : > { %5113 = vmatprep.subr.msk.mxu0 %vm1489_vm1, %v3244_v5 }
 0xe46   : > { %v3238_v15 = vpop.permute.xlu1 %3237 }
 0xe48   : > { %v3531_v18 = vpop.permute.xlu0 %3530 }
 0xe4a   : > { %v3240_v19 = vpop.permute.xlu1 %3239 }
 0xe4c   : > { %v5478_v11 = vpop.eup %5477  ;;  %v3525_v21 = vpop.permute.xlu0 %3524 }
 0xe4d   : > { %v3072_v17 = vmul.f32 %v5478_v11, %v5474_v63 }
 0xe4e   : > { %v5480_v14 = vpop.eup %5479  ;;  %v3529_v22 = vpop.permute.xlu1 %3528 }
 0xe4f   : > { %v3071_v16 = vmul.f32 %v5480_v14, %v5476_v1 }
 0xe51   : > { %5105 = vmatprep.mubr.msk.f32.mxu0 %vm1579_vm2, %v3071_v16 }
 0xe52   : > { %5106 = vmatmul.mubr.msk.f32.vlgmr.msra.gmra.mxu0 %vm1579_vm2, %v3072_v17  ;;  %v3527_v23 = vpop.permute.xlu1 %3526 }
 0xe53   : > { %5114 = vmatpush3.xpose.msk.msra.mxu0 %vm1489_vm1, %v3244_v5  ;;  %5117 = vmatprep.mubr.msk.f32.mxu0 %vm1489_vm1, %v3238_v15 }
 0xe54   : > { %5115 = vmatprep.subr.msk.mxu0 %vm1489_vm1, %v3242_v10 }
 0xe57   : > { %5116 = vmatpush3.xpose.msk.msra.mxu0 %vm1489_vm1, %v3242_v10 }
 0xe58   : > { %5132 = vmatprep.subr.msk.mxu0 %vm1489_vm1, %v3531_v18 }
 0xe5a   : > { %5118 = vmatmul.mubr.msk.f32.vlgmr.msra.gmra.mxu0 %vm1489_vm1, %v3240_v19 }
 0xe5b   : > { %5133 = vmatpush3.xpose.msk.msra.mxu0 %vm1489_vm1, %v3531_v18  ;;  %5136 = vmatprep.mubr.msk.f32.mxu0 %vm1489_vm1, %v3525_v21 }
 0xe5c   : > { %5134 = vmatprep.subr.msk.mxu0 %vm1489_vm1, %v3529_v22 }
 0xe5f   : > { %5135 = vmatpush3.xpose.msk.msra.mxu0 %vm1489_vm1, %v3529_v22 }
 0xe62   : > { %5137 = vmatmul.mubr.msk.f32.vlgmr.msra.gmra.mxu0 %vm1489_vm1, %v3527_v23 }
 0xf12   : > { %v5107_v28 = vpop.f32.mrf.mxu0 }
 0xf14   : > { %v3145_v29 = vpop.f32.mrf.mxu0 }
 0xf15   : > { %5110 = vmatprep.mubr.msk.f32.mxu1 %vm1489_vm1, %v3145_v29 }
 0xf16   : > { %5111 = vmatmul.mubr.msk.f32.vlgmr.msra.gmra.mxu1 %vm1489_vm1, %v5107_v28 }
 0xf1a   : > { %v5119_v20 = vpop.f32.mrf.mxu0 }
 0xf1b   : > { %v3329_v30 = vmul.f32 0.35355338, %v5119_v20 }
 0xf1c   : > { %v3319_v24 = vpop.f32.mrf.mxu0 }
 0xf1d   : > { %v3328_v27 = vmul.f32 0.35355338, %v3319_v24  ;;  %v3333_v31 = vsel %vm1579_vm2, %v3329_v30, -inf }
 0xf1e   : > { %3334 = vmax.xlane.f32.xlu1 %v3333_v31 }
 0xf1f   : > { %v3330_v32 = vsel %vm1579_vm2, %v3328_v27, -inf }
 0xf20   : > { %3331 = vmax.xlane.f32.xlu0 %v3330_v32 }
 0xf22   : > { %v5138_v33 = vpop.f32.mrf.mxu0 }
 0xf23   : > { %v3616_v34 = vmul.f32 0.35355338, %v5138_v33 }
 0xf24   : > { %v3606_v49 = vpop.f32.mrf.mxu0 }
 0xf25   : > { %v3620_v37 = vsel %vm1579_vm2, %v3616_v34, -inf  ;;  %v3615_v51 = vmul.f32 0.35355338, %v3606_v49 }
 0xf27   : > { %v3617_v53 = vsel %vm1579_vm2, %v3615_v51, -inf }
 0xf2f   : > { %3354 = vrot.lane.b32.xlu1 %v6659_v12, %s6075_s28 }
 0xf33   : > { %3815 = vrot.lane.b32.xlu1 %v6629_v39, %s6077_s2 }
 0xf37   : > { %3813 = vrot.lane.b32.xlu1 %v6633_v7, %s6077_s2 }
 0xf3b   : > { %3811 = vrot.lane.b32.xlu1 %v6643_v42, %s6077_s2 }
 0xf5f   : > { %3621 = vmax.xlane.f32.xlu1 %v3620_v37 }
 0xf70   : > { %3639 = vrot.lane.b32.xlu1 %v6659_v12, %s6076_s26 }
 0xfa7   : > { %v3335_v38 = vpop.xlane.xlu1 %3334 }
 0xfa8   : > { %v3337_v52 = vsub.f32 %v3329_v30, %v3335_v38 }
 0xfa9   : > { %v3332_v50 = vpop.xlane.xlu0 %3331 }
 0xfaa   : > { %v3340_v6 = vmul.f32 1.442695, %v3337_v52  ;;  %v3336_v8 = vsub.f32 %v3328_v27, %v3332_v50  ;;  %v2691_v27 = vld [vmem:[%s6894_s11 + $0x10] sm:$0xff] }
 0xfab   : > { %v3355_v39 = vpop.permute.xlu1 %3354 }
 0xfac   : > { %5481 = vpow2.f32 %v3340_v6  ;;  %v3338_v9 = vmul.f32 1.442695, %v3336_v8 }
 0xfae   : > { %5483 = vpow2.f32 %v3338_v9 }
 0xfaf   : > { %v3816_v7 = vpop.permute.xlu1 %3815 }
 0xfb0   : > { %5151 = vmatprep.subr.msk.mxu0 %vm1489_vm1, %v3816_v7 }
 0xfb1   : > { %5152 = vmatpush3.xpose.msk.msra.mxu0 %vm1489_vm1, %v3816_v7 }
 0xfb3   : > { %v3814_v40 = vpop.permute.xlu1 %3813 }
 0xfb4   : > { %5153 = vmatprep.subr.msk.mxu0 %vm1489_vm1, %v3814_v40 }
 0xfb5   : > { %5154 = vmatpush3.xpose.msk.msra.mxu0 %vm1489_vm1, %v3814_v40 }
 0xfb7   : > { %v3812_v46 = vpop.permute.xlu1 %3811 }
 0xfb9   : > { %v5482_v42 = vpop.eup %5481 }
 0xfba   : > { %v3345_v43 = vsel %vm1579_vm2, %v5482_v42, 0.0 }
 0xfbb   : > { %v5484_v44 = vpop.eup %5483  ;;  %3346 = vadd.xlane.f32.xlu0 %v3345_v43 }
 0xfbc   : > { %v3342_v45 = vsel %vm1579_vm2, %v5484_v44, 0.0 }
 0xfbf   : > { %3343 = vadd.xlane.f32.xlu0 %v3342_v45 }
 0xfd5   : > { %3356 = vrot.lane.b32.xlu0 %v6653_v56, %s6075_s28  ;;  %s6899_s28 = sld [smem:[#allocation50_spill]] }
 0xfd6   : > { %v5112_v11 = vpop.f32.mrf.mxu1 }
 0xfd8   : > { %v6731_v18 = vpop.f32.mrf.mxu1 }
 0xfd9   : > { %3809 = vrot.lane.b32.xlu0 %v6641_v41, %s6077_s2 }
 0xfe8   : > { %v3622_v26 = vpop.xlane.xlu1 %3621 }
 0xfe9   : > { %v3624_v47 = vsub.f32 %v3616_v34, %v3622_v26 }
 0xfeb   : > { %v3627_v48 = vmul.f32 1.442695, %v3624_v47 }
 0xfec   : > { %v3640_v28 = vpop.permute.xlu1 %3639 }
 0xfed   : > { %5485 = vpow2.f32 %v3627_v48 }
 0xff8   : > { %3618 = vmax.xlane.f32.xlu0 %v3617_v53 }
 0xffa   : > { %v5486_v54 = vpop.eup %5485 }
 0xffb   : > { %v3632_v55 = vsel %vm1579_vm2, %v5486_v54, 0.0 }
 0xffc   : > { %3633 = vadd.xlane.f32.xlu0 %v3632_v55 }
0x1044   : > { %v3347_v57 = vpop.xlane.xlu0 %3346 }
0x1045   : > { %5487 = vrcp.f32 %v3347_v57 }
0x1048   : > { %v3344_v58 = vpop.xlane.xlu0 %3343 }
0x1049   : > { %5489 = vrcp.f32 %v3344_v58 }
0x104c   : > { %v3357_v59 = vpop.permute.xlu0 %3356 }
0x104d   : > { %5120 = vmatprep.subr.mxu1 %v3357_v59 }
0x104e   : > { %5121 = vmatpush3.msra.mxu1 %v3357_v59 }
0x104f   : > { %5122 = vmatprep.subr.mxu1 %v3355_v39 }
0x1050   : > { %5123 = vmatpush3.msra.mxu1 %v3355_v39  ;;  %v3810_v41 = vpop.permute.xlu0 %3809  ;;  %v4760_v39 = vld [vmem:[%s6895_s1] ss:$0 sm:$0xff] }
0x1051   : > { %5155 = vmatprep.mubr.msk.f32.mxu0 %vm1489_vm1, %v3810_v41  ;;  %5127 = vmatprep.subr.mxu1 %v2690_v4  ;;  %v3236_v9 = vadd.f32 %v5112_v11, %v4760_v39  ;;  %v3235_v59 = vadd.f32 %v4760_v39, %v6731_v18 }
0x1052   : > { %5156 = vmatmul.mubr.msk.f32.vlgmr.msra.gmra.mxu0 %vm1489_vm1, %v3812_v46  ;;  %v5488_v60 = vpop.eup %5487 }
0x1053   : > { %v3351_v63 = vmul.f32 %v5488_v60, %v5482_v42 }
0x1056   : > { %v5490_v61 = vpop.eup %5489 }
0x1057   : > { %v3350_v62 = vmul.f32 %v5490_v61, %v5484_v44 }
0x1059   : > { %5124 = vmatprep.mubr.msk.f32.mxu1 %vm1579_vm2, %v3350_v62 }
0x105a   : > { %5125 = vmatmul.mubr.msk.f32.vlgmr.msra.gmra.mxu1 %vm1579_vm2, %v3351_v63 }
0x105b   : > { %5128 = vmatpush3.msra.mxu1 %v2690_v4 }
0x1081   : > { %v3619_v0 = vpop.xlane.xlu0 %3618 }
0x1082   : > { %v3623_v1 = vsub.f32 %v3615_v51, %v3619_v0 }
0x1084   : > { %v3625_v13 = vmul.f32 1.442695, %v3623_v1 }
0x1085   : > { %v3634_v19 = vpop.xlane.xlu0 %3633 }
0x1086   : > { %5491 = vpow2.f32 %v3625_v13 }
0x1087   : > { %5493 = vrcp.f32 %v3634_v19  ;;  %v4142_v19 = vld [vmem:[#allocation26 + $0x10] sm:$0xff] }
0x1093   : > { %v5492_v2 = vpop.eup %5491 }
0x1094   : > { %v3629_v3 = vsel %vm1579_vm2, %v5492_v2, 0.0  ;;  %v5494_v29 = vpop.eup %5493 }
0x1095   : > { %3630 = vadd.xlane.f32.xlu0 %v3629_v3  ;;  %v3638_v24 = vmul.f32 %v5494_v29, %v5486_v54  ;;  %v4238_v29 = vld [vmem:[%s6896_s21 + $0x20] sm:$0xff] }
0x10ab   : > { %3641 = vrot.lane.b32.xlu0 %v6653_v56, %s6076_s26  ;;  %s1170_s26 = sand.u32 1, %s6017_s16  }
0x10ac   : > { %s6788_s1 = scalar_lea.sflag [#allocation4], %s1170_s26 }
0x1112   : > { %v5157_v5 = vpop.f32.mrf.mxu0 }
0x1113   : > { %v3901_v10 = vmul.f32 0.35355338, %v5157_v5 }
0x1114   : > { %v3891_v14 = vpop.f32.mrf.mxu0 }
0x1115   : > { %v3900_v15 = vmul.f32 0.35355338, %v3891_v14  ;;  %v3905_v16 = vsel %vm1579_vm2, %v3901_v10, -inf }
0x1116   : > { %3906 = vmax.xlane.f32.xlu0 %v3905_v16 }
0x1117   : > { %v3902_v17 = vsel %vm1579_vm2, %v3900_v15, -inf }
0x1118   : > { %3903 = vmax.xlane.f32.xlu1 %v3902_v17 }
0x111a   : > { %v5126_v21 = vpop.f32.mrf.mxu1 }
0x111c   : > { %v3432_v22 = vpop.f32.mrf.mxu1 }
0x111d   : > { %5129 = vmatprep.mubr.msk.f32.mxu1 %vm1489_vm1, %v3432_v22  ;;  %v4140_v22 = vld [vmem:[#allocation26] sm:$0xff] }
0x111e   : > { %5130 = vmatmul.mubr.msk.f32.vlgmr.msra.gmra.mxu1 %vm1489_vm1, %v5126_v21  ;;  %v3631_v23 = vpop.xlane.xlu0 %3630  ;;  %v4141_v21 = vld [vmem:[#allocation26 + $0x8] sm:$0xff] }
0x111f   : > { %5495 = vrcp.f32 %v3631_v23  ;;  %v4241_v23 = vld [vmem:[%s6896_s21 + $0x38] sm:$0xff] }
0x1122   : > { %v3642_v25 = vpop.permute.xlu0 %3641 }
0x1123   : > { %5139 = vmatprep.subr.mxu1 %v3642_v25 }
0x1124   : > { %5140 = vmatpush3.msra.mxu1 %v3642_v25  ;;  %v4240_v25 = vld [vmem:[%s6896_s21 + $0x30] sm:$0xff] }
0x1125   : > { %5141 = vmatprep.subr.mxu1 %v3640_v28 }
0x1126   : > { %5142 = vmatpush3.msra.mxu1 %v3640_v28  ;;  %v4239_v28 = vld [vmem:[%s6896_s21 + $0x28] sm:$0xff] }
0x1127   : > { %5146 = vmatprep.subr.mxu1 %v2691_v27 }
0x112c   : > { %v5496_v20 = vpop.eup %5495 }
0x112d   : > { %v3637_v30 = vmul.f32 %v5496_v20, %v5492_v2 }
0x112f   : > { %5143 = vmatprep.mubr.msk.f32.mxu1 %vm1579_vm2, %v3637_v30 }
0x1130   : > { %5144 = vmatmul.mubr.msk.f32.vlgmr.msra.gmra.mxu1 %vm1579_vm2, %v3638_v24 }
0x1131   : > { %5147 = vmatpush3.msra.mxu1 %v2691_v27 }
0x119f   : > { %v3907_v31 = vpop.xlane.xlu0 %3906 }
0x11a0   : > { %v3909_v32 = vsub.f32 %v3901_v10, %v3907_v31 }
0x11a1   : > { %v3904_v33 = vpop.xlane.xlu1 %3903 }
0x11a2   : > { %v3912_v34 = vmul.f32 1.442695, %v3909_v32  ;;  %v3908_v37 = vsub.f32 %v3900_v15, %v3904_v33 }
0x11a4   : > { %5497 = vpow2.f32 %v3912_v34  ;;  %v3910_v38 = vmul.f32 1.442695, %v3908_v37  ;;  %v4793_v34 = vld [vmem:[%s6897_s23] ss:$0 sm:$0xff] }
0x11a6   : > { %5499 = vpow2.f32 %v3910_v38 }
0x11b1   : > { %v5498_v52 = vpop.eup %5497 }
0x11b2   : > { %v3917_v50 = vsel %vm1579_vm2, %v5498_v52, 0.0 }
0x11b3   : > { %v5500_v6 = vpop.eup %5499  ;;  %3918 = vadd.xlane.f32.xlu1 %v3917_v50 }
0x11b4   : > { %v3914_v8 = vsel %vm1579_vm2, %v5500_v6, 0.0 }
0x11b5   : > { %3915 = vadd.xlane.f32.xlu0 %v3914_v8 }
0x11c4   : > { %3924 = vrot.lane.b32.xlu1 %v6659_v12, %s6077_s2 }
0x11cb   : > { %3926 = vrot.lane.b32.xlu0 %v6653_v56, %s6077_s2  ;;  %v2692_v56 = vld [vmem:[%s6894_s11 + $0x18] sm:$0xff]  ;;  %s4700_s2 = sshll.u32 %s1170_s26, 4 }
0x11cc   : > { %s1172_s29 = scalar_lea.vmem [#allocation28], %s4700_s2 }
0x11cd   : > { %s4393_s10 = sshll.u32 %s1172_s29, 4  ;;  %s6784_s10 = int_to_ptr.vmem [resolvable:$true] %s4393_s10 }
0x11ce   : > { %s5929_s23 = scalar_lea.vmem %s6784_s10, 256 }
0x11cf   : > { %p5930_p12 = scmp.ne.s32.totalorder %s6784_s10, %s5929_s23 }
0x11d1   : > { %p5931_p7 = pnand %p5930_p12, %p6900_p2 }
0x11d3   : > { %p5932_p10 = pneg %p5931_p7 }
0x11de   : > { %v5131_v7 = vpop.f32.mrf.mxu1 }
0x11df   : > { %v3523_v40 = vadd.f32 %v5131_v7, %v3236_v9  ;;  %v4237_v7 = vld [vmem:[%s6896_s21 + $0x18] sm:$0xff] }
0x11e0   : > { %v3513_v42 = vpop.f32.mrf.mxu1 }
0x11e1   : > { %v3522_v41 = vadd.f32 %v3513_v42, %v3235_v59  ;;  %v4235_v42 = vld [vmem:[%s6896_s21 + $0x8] sm:$0xff] }
0x11f0   : > { %v5145_v43 = vpop.f32.mrf.mxu1 }
0x11f2   : > { %v3717_v44 = vpop.f32.mrf.mxu1 }
0x11f3   : > { %5148 = vmatprep.mubr.msk.f32.mxu1 %vm1489_vm1, %v3717_v44  ;;  %v4795_v44 = vld [vmem:[%s6898_s18] ss:$0 sm:$0xff]  ;;  %s5933_s18 = sshll.u32 %s6078_s0, 4  ;;  %s5934_s18 = int_to_ptr.vmem [resolvable:$false] %s5933_s18 }
0x11f4   : > { %5149 = vmatmul.mubr.msk.f32.vlgmr.msra.gmra.mxu1 %vm1489_vm1, %v5145_v43  ;;  %v4234_v43 = vld [vmem:[%s6896_s21] sm:$0xff]  ;;  %p5936_p4 = scmp.lt.s32.totalorder %s6784_s10, %s5934_s18 }
0x123c   : > { %v3919_v45 = vpop.xlane.xlu1 %3918 }
0x123d   : > { %5501 = vrcp.f32 %v3919_v45 }
0x123e   : > { %v3916_v46 = vpop.xlane.xlu0 %3915 }
0x123f   : > { %5503 = vrcp.f32 %v3916_v46 }
0x1240   : > { %v3925_v26 = vpop.permute.xlu1 %3924 }
0x1242   : > { %v3927_v12 = vpop.permute.xlu0 %3926 }
0x1243   : > { %5158 = vmatprep.subr.mxu1 %v3927_v12 }
0x1244   : > { %5159 = vmatpush3.msra.mxu1 %v3927_v12 }
0x1245   : > { %5160 = vmatprep.subr.mxu1 %v3925_v26 }
0x1246   : > { %5161 = vmatpush3.msra.mxu1 %v3925_v26 }
0x1247   : > { %5165 = vmatprep.subr.mxu1 %v2692_v56 }
0x124a   : > { %v5502_v47 = vpop.eup %5501 }
0x124b   : > { %v3923_v51 = vmul.f32 %v5502_v47, %v5498_v52 }
0x124c   : > { %v5504_v48 = vpop.eup %5503 }
0x124d   : > { %v3922_v49 = vmul.f32 %v5504_v48, %v5500_v6  ;;  %v4794_v6 = vld [vmem:[%s6224_s13] ss:$0 sm:$0xff] }
0x124e   : > { %v4798_v48 = vld [vmem:[%s6899_s28] ss:$0 sm:$0xff]  ;;  %s5935_s28 = scalar_lea.vmem %s5934_s18, 512 }
0x124f   : > { %5162 = vmatprep.mubr.msk.f32.mxu1 %vm1579_vm2, %v3922_v49  ;;  %p5937_p8 = scmp.lt.s32.totalorder %s5935_s28, %s5929_s23 }
0x1250   : > { %5163 = vmatmul.mubr.msk.f32.vlgmr.msra.gmra.mxu1 %vm1579_vm2, %v3923_v51 }
0x1251   : > { %5166 = vmatpush3.msra.mxu1 %v2692_v56  ;;  %p5938_p11 = por %p5937_p8, %p5936_p4 }
0x1252   : > { %5181 = vmatprep.subr.mxu1 %v4241_v23 }
0x1253   : > { %p5939_p0 = pnand %p5938_p11, %p5932_p10 }
0x12b4   : > { %v5150_v53 = vpop.f32.mrf.mxu1 }
0x12b5   : > { %v3808_v54 = vadd.f32 %v5150_v53, %v3523_v40  ;;  %v4236_v40 = vld [vmem:[%s6896_s21 + $0x10] sm:$0xff] }
0x12b6   : > { %v3798_v55 = vpop.f32.mrf.mxu1 }
0x12b7   : > { %v3807_v61 = vadd.f32 %v3798_v55, %v3522_v41 }
0x1310   : > { %v5164_v57 = vpop.f32.mrf.mxu1 }
0x1312   : > { %v4002_v58 = vpop.f32.mrf.mxu1 }
0x1313   : > { %5167 = vmatprep.mubr.msk.f32.mxu1 %vm1489_vm1, %v4002_v58 }
0x1314   : > { %5168 = vmatmul.mubr.msk.f32.vlgmr.msra.gmra.mxu1 %vm1489_vm1, %v5164_v57 }
0x1315   : > { %5182 = vmatpush3.msra.mxu1 %v4241_v23 }
0x1316   : > { %5183 = vmatprep.subr.mxu1 %v4240_v25 }
0x1317   : > { %5184 = vmatpush3.msra.mxu1 %v4240_v25 }
0x1318   : > { %5185 = vmatprep.subr.mxu1 %v4239_v28 }
0x1319   : > { %5186 = vmatpush3.msra.mxu1 %v4239_v28 }
0x131a   : > { %5187 = vmatprep.subr.mxu1 %v4238_v29 }
0x131b   : > { %5188 = vmatpush3.msra.mxu1 %v4238_v29 }
0x131c   : > { %5189 = vmatprep.subr.mxu1 %v4237_v7 }
0x131d   : > { %5190 = vmatpush3.msra.mxu1 %v4237_v7 }
0x131e   : > { %5191 = vmatprep.subr.mxu1 %v4236_v40 }
0x131f   : > { %5192 = vmatpush3.msra.mxu1 %v4236_v40 }
0x1320   : > { %5193 = vmatprep.subr.mxu1 %v4235_v42 }
0x1321   : > { %5194 = vmatpush3.msra.mxu1 %v4235_v42 }
0x1322   : > { %5195 = vmatprep.subr.mxu1 %v4234_v43 }
0x1323   : > { %5196 = vmatpush3.msra.mxu1 %v4234_v43 }
0x13d4   : > { %v5169_v60 = vpop.f32.mrf.mxu1 }
0x13d5   : > { %v4093_v62 = vadd.f32 %v5169_v60, %v3808_v54 }
0x13d6   : > { %v4083_v63 = vpop.f32.mrf.mxu1 }
0x13d7   : > { %v4092_v0 = vadd.f32 %v4083_v63, %v3807_v61  ;;  %v4095_v1 = vadd.f32 %v4093_v62, %v6618_v35 }
0x13d9   : > { %v4101_v13 = vsel %vm1226_vm0, %v4095_v1, 0.0  ;;  %v4094_v2 = vadd.f32 %v4092_v0, %v6620_v36  ;;  %v4143_v36 = vld [vmem:[#allocation26 + $0x18] sm:$0xff] }
0x13da   : > { %4102 = vadd.xlane.f32.xlu0 %v4101_v13  ;;  %5170 = vmatprep.subr.mxu0 %v4143_v36 }
0x13db   : > { %v4098_v3 = vsel %vm1226_vm0, %v4094_v2, 0.0  ;;  %5171 = vmatpush3.msra.mxu0 %v4143_v36  ;;  %v4802_v36 = vld [vmem:[%s6234_s4] ss:$0 sm:$0xff] }
0x13dc   : > { %4099 = vadd.xlane.f32.xlu1 %v4098_v3  ;;  %5172 = vmatprep.subr.mxu0 %v4142_v19 }
0x13dd   : > { %5173 = vmatpush3.msra.mxu0 %v4142_v19 }
0x13de   : > { %5174 = vmatprep.subr.mxu0 %v4141_v21 }
0x13df   : > { %5175 = vmatpush3.msra.mxu0 %v4141_v21 }
0x13e0   : > { %5176 = vmatprep.subr.mxu0 %v4140_v22 }
0x13e1   : > { %5177 = vmatpush3.msra.mxu0 %v4140_v22 }
0x1463   : > { %v4103_v4 = vpop.xlane.xlu0 %4102 }
0x1464   : > { %v4105_v5 = vmul.f32 0.03125, %v4103_v4 }
0x1465   : > { %v4100_v10 = vpop.xlane.xlu1 %4099 }
0x1466   : > { %v4107_v11 = vsub.f32 %v4095_v1, %v4105_v5  ;;  %v4104_v14 = vmul.f32 0.03125, %v4100_v10 }
0x1468   : > { %v4106_v15 = vsub.f32 %v4094_v2, %v4104_v14  ;;  %v4109_v16 = vmul.f32 %v4107_v11, %v4107_v11 }
0x146a   : > { %v4113_v17 = vsel %vm1226_vm0, %v4109_v16, 0.0  ;;  %v4108_v18 = vmul.f32 %v4106_v15, %v4106_v15 }
0x146b   : > { %4114 = vadd.xlane.f32.xlu1 %v4113_v17  ;;  %v4801_v17 = vld [vmem:[%s6229_s5] ss:$0 sm:$0xff] }
0x146c   : > { %v4110_v35 = vsel %vm1226_vm0, %v4108_v18, 0.0 }
0x146d   : > { %4111 = vadd.xlane.f32.xlu0 %v4110_v35 }
0x14f4   : > { %v4115_v20 = vpop.xlane.xlu1 %4114 }
0x14f5   : > { %v4117_v30 = vmul.f32 0.03125, %v4115_v20 }
0x14f6   : > { %v4112_v24 = vpop.xlane.xlu0 %4111 }
0x14f7   : > { %v4119_v27 = vadd.f32 1e-05, %v4117_v30  ;;  %v4116_v31 = vmul.f32 0.03125, %v4112_v24 }
0x14f9   : > { %5505 = vrsqrt.f32 %v4119_v27  ;;  %v4118_v32 = vadd.f32 1e-05, %v4116_v31 }
0x14fb   : > { %5507 = vrsqrt.f32 %v4118_v32 }
0x1506   : > { %v5506_v33 = vpop.eup %5505 }
0x1507   : > { %v4123_v37 = vmul.f32 %v5506_v33, %v4107_v11 }
0x1508   : > { %v5508_v38 = vpop.eup %5507 }
0x1509   : > { %v4122_v52 = vmul.f32 %v5508_v38, %v4106_v15  ;;  %v4131_v50 = vmul.f32 %v4793_v34, %v4123_v37 }
0x150b   : > { %v4130_v8 = vmul.f32 %v4793_v34, %v4122_v52  ;;  %v4139_v9 = vadd.f32 %v4794_v6, %v4131_v50 }
0x150d   : > { %v4138_v39 = vadd.f32 %v4794_v6, %v4130_v8 }
0x150f   : > { %5178 = vmatprep.mubr.msk.f32.mxu0 %vm1226_vm0, %v4138_v39 }
0x1510   : > { %5179 = vmatmul.mubr.msk.f32.vlgmr.msra.gmra.mxu0 %vm1226_vm0, %v4139_v9 }
0x15d0   : > { %v5180_v45 = vpop.f32.mrf.mxu0 }
0x15d1   : > { %v4229_v46 = vadd.f32 %v5180_v45, %v4795_v44 }
0x15d2   : > { %v4223_v12 = vpop.f32.mrf.mxu0 }
0x15d3   : > { %v4224_v26 = vadd.f32 %v4795_v44, %v4223_v12  ;;  %v4233_v47 = vmax.f32 %v4229_v46, 0.0 }
0x15d5   : > { %v4232_v56 = vmax.f32 %v4224_v26, 0.0 }
0x15d7   : > { %5197 = vmatprep.mubr.msk.f32.mxu1 %vm4249_vm3, %v4232_v56 }
0x15d8   : > { %5198 = vmatmul.mubr.msk.f32.vlgmr.msra.gmra.mxu1 %vm4249_vm3, %v4233_v47 }
0x1698   : > { %v5199_v49 = vpop.f32.mrf.mxu1 }
0x1699   : > { %v4328_v51 = vadd.f32 %v5199_v49, %v4798_v48 }
0x169a   : > { %v4322_v53 = vpop.f32.mrf.mxu1 }
0x169b   : > { %v4323_v54 = vadd.f32 %v4798_v48, %v4322_v53  ;;  %v4332_v55 = vadd.f32 %v4328_v51, %v4139_v9 }
0x169d   : > { %v4338_v57 = vsel %vm1226_vm0, %v4332_v55, 0.0  ;;  %v4331_v58 = vadd.f32 %v4323_v54, %v4138_v39 }
0x169e   : > { %4339 = vadd.xlane.f32.xlu1 %v4338_v57 }
0x169f   : > { %v4335_v59 = vsel %vm1226_vm0, %v4331_v58, 0.0 }
0x16a0   : > { %4336 = vadd.xlane.f32.xlu0 %v4335_v59 }
0x1727   : > { %v4340_v41 = vpop.xlane.xlu1 %4339 }
0x1728   : > { %v4342_v60 = vmul.f32 0.03125, %v4340_v41 }
0x1729   : > { %v4337_v61 = vpop.xlane.xlu0 %4336 }
0x172a   : > { %v4344_v62 = vsub.f32 %v4332_v55, %v4342_v60  ;;  %v4341_v63 = vmul.f32 0.03125, %v4337_v61 }
0x172c   : > { %v4343_v0 = vsub.f32 %v4331_v58, %v4341_v63  ;;  %v4346_v1 = vmul.f32 %v4344_v62, %v4344_v62 }
0x172e   : > { %v4350_v13 = vsel %vm1226_vm0, %v4346_v1, 0.0  ;;  %v4345_v2 = vmul.f32 %v4343_v0, %v4343_v0 }
0x172f   : > { %4351 = vadd.xlane.f32.xlu1 %v4350_v13 }
0x1730   : > { %v4347_v3 = vsel %vm1226_vm0, %v4345_v2, 0.0 }
0x1731   : > { %4348 = vadd.xlane.f32.xlu0 %v4347_v3 }
0x17b8   : > { %v4352_v4 = vpop.xlane.xlu1 %4351 }
0x17b9   : > { %v4354_v5 = vmul.f32 0.03125, %v4352_v4 }
0x17ba   : > { %v4349_v10 = vpop.xlane.xlu0 %4348 }
0x17bb   : > { %v4356_v11 = vadd.f32 1e-05, %v4354_v5  ;;  %v4353_v14 = vmul.f32 0.03125, %v4349_v10 }
0x17bd   : > { %5509 = vrsqrt.f32 %v4356_v11  ;;  %v4355_v15 = vadd.f32 1e-05, %v4353_v14 }
0x17bf   : > { %5511 = vrsqrt.f32 %v4355_v15 }
0x17ca   : > { %v5510_v16 = vpop.eup %5509 }
0x17cb   : > { %v4360_v18 = vmul.f32 %v5510_v16, %v4344_v62 }
0x17cc   : > { %v5512_v35 = vpop.eup %5511 }
0x17cd   : > { %v4368_v19 = vmul.f32 %v4801_v17, %v4360_v18  ;;  %v4359_v21 = vmul.f32 %v5512_v35, %v4343_v0 }
0x17cf   : > { %v4376_v22 = vadd.f32 %v4802_v36, %v4368_v19  ;;  %v4367_v23 = vmul.f32 %v4801_v17, %v4359_v21 }
0x17d1   : > { %v4375_v25 = vadd.f32 %v4802_v36, %v4367_v23  ;;  %4378 = vst.msk [vmem:[%s1172_s29 + $0x8] sm:$0xff] %vm1226_vm0, %v4376_v22 }
0x17d3   : > { %4377 = vst.msk [vmem:[%s1172_s29] sm:$0xff] %vm1226_vm0, %v4375_v25 }
0x17d4   : > { %5942 = shalt.err (!%p5939_p0)
}
0x17d5   : > { %s5943_s26 = scalar_lea.hbm %s6782_s15, 256  ;;  %s5947_s2 = scalar_lea.hbm %s6239_s9, 512 }
0x17d6   : > { %p5944_p6 = scmp.ne.s32.totalorder %s6782_s15, %s5943_s26  ;;  %p5948_p1 = scmp.lt.s32.totalorder %s6782_s15, %s6239_s9 }
0x17d7   : > { %p5949_p5 = scmp.lt.s32.totalorder %s5947_s2, %s5943_s26 }
0x17d8   : > { %p5945_p9 = pnand %p5944_p6, %p6900_p2 }
0x17d9   : > { %p5950_p3 = por %p5949_p5, %p5948_p1 }
0x17da   : > { %p5946_p13 = pneg %p5945_p9 }
0x17dc   : > { %p5951_p12 = pnand %p5950_p3, %p5946_p13 }
0x17de   : > { %5954 = shalt.err (!%p5951_p12)
}
0x17df   : > { %s6079_s22 = smov 128   ;;  %s6080_s29 = smov 8  }
0x17e0   : > { %5264 = dma.vmem_to_hbm [thread:$0]  (%p6900_p2), %s6784_s10, 256, %s6782_s15, %s6788_s1, %s6079_s22, %s6079_s22, %s6080_s29  }
0x17e1 PF: > { %s6901_s23 = sld [smem:[#allocation56_spill]] }
0x17e2   : > { %s6902_s0 = sld [smem:[#allocation54_spill]] }
0x17e3   : > { %s6903_s18 = sld [smem:[#allocation59_spill]] }
0x17e7   : > { %p5351_p7 = scmp.ge.s32.totalorder %s6901_s23, 2 }
0x17e8   : > { %s4408_s28 = sand.u32 1, %s6902_s0  }
0x17e9   : > { %p6904_p10 = scmp.ne.s32.totalorder %s6903_s18, 0  ;;  %s4409_s26 = scalar_lea.sflag [#allocation4], %s4408_s28 }
0x17eb   : > { %p5316_p4 = pnand %p5351_p7, %p6904_p10 }
0x17ed   : > { %p5317_p8 = pneg %p5316_p4 }
0x17ef   : > { %6008 = dma.done.wait (%p5317_p8), %s4409_s26, 256  }
0x17f0   : > { %6010 = vsyncadd (%p5317_p8), %s4409_s26, 4294967040  ;;  %s6905_s22 = sld [smem:[#allocation57_spill]]  ;;  %s6908_s15 = smov %s6017_s16 }
0x17f1   : > { %s6906_s2 = sld [smem:[#allocation55_spill]] }
0x17f2   : > { %s6907_s18 = sld [smem:[#allocation58_spill]] }
0x17f6   : > { %p80_p11 = scmp.ge.s32.totalorder %s6905_s22, 4  }
0x17f7   : > { %s6909_s16 = smov %s6906_s2 }
0x17f8   :  { %82 = sbr.rel (!%p80_p11) target bundleno = 65 (0x41), region = 276 }
0x17fd   :  { %4414 = vsyncpa [#allocation3], 1 }
0x17fe   :  { %4416 = vsyncpa [#allocation3 + $0x1], 1 }
0x17ff   :  { %4417 = vsyncpa [#allocation6], 1 }
0x1800   :  { %4418 = vsyncpa [#allocation9], 1 }
0x1801   :  { %4419 = vsyncpa [#allocation12], 1 }
0x1802   :  { %4420 = vsyncpa [#allocation15], 1 }
0x1803   :  { %4421 = vsyncpa [#allocation18], 1 }
0x1804   :  { %4422 = vsyncpa [#allocation21], 1 }
0x1805   :  { %4423 = vsyncpa [#allocation24], 1 }
0x1806   :  { %4424 = vsyncpa [#allocation27], 1 }
0x1807   :  { %4425 = vsyncpa [#allocation4], 1 }
0x1808   :  { %4427 = vsyncpa [#allocation4 + $0x1], 1 }

</bundles_post_ra>
